<compile_context>
chip_gen: v7x
topology: tpu7x:2x2x1
jax: 0.10.0
libtpu: 0.0.40
codegen_flags: <defaults>
</compile_context>

<pallas_src>
import jax
import jax.numpy as jnp
from jax.experimental import pallas as pl
from jax.experimental.pallas import tpu as pltpu

# ---------------- configuration (small but consistent with the module) -------
SHAPE = (8, 8, 8)            # (depth, height, width) of the input volume
OUTPUT_SHAPE = (6, 6, 6)     # central cutout shape
D_MODEL = 32
N_HEADS = 4
N_LAYERS = 2
DIM_FF = 64
PATCH = 4
BATCH = 2

P3 = PATCH ** 3                      # 64  (flattened patch size, 1 channel)
N_PATCH = SHAPE[2] // PATCH          # 2
SEQ = N_PATCH ** 3                   # 8
HEAD_DIM = D_MODEL // N_HEADS        # 8
LN_EPS = 1e-5
OUT_LANES = 128                      # lane-dense padded output width (>= P3)

# TODO(synk): nn.Dropout has no Pallas equivalent worth faking; eval-mode
# (identity) semantics are implemented, matching model.eval() inference.


# ----------------------------- fused kernel ----------------------------------
def vit_fused_kernel(patches_ref, pe_w_ref, pe_b_ref, pos_ref,
                     wqkv_ref, bqkv_ref, wo_ref, bo_ref,
                     g1_ref, be1_ref, w1_ref, b1_ref, w2_ref, b2_ref,
                     g2_ref, be2_ref, up_w_ref, up_b_ref, o_ref):
    # One grid step == one batch element: patches_ref is (SEQ, P3).
    # ---- patch embedding (stride==kernel conv3d as matmul) + positional add ----
    h = jnp.dot(patches_ref[...], pe_w_ref[...],
                preferred_element_type=jnp.float32)
    h = h + (pe_b_ref[...] + pos_ref[...])                          # (SEQ, D)

    scale = jnp.float32(1.0 / (HEAD_DIM ** 0.5))

    for l in range(N_LAYERS):                                       # static unroll
        x = h

        # ---- multi-head self attention: fused QKV projection (lane-dense) ----
        qkv = jnp.dot(x, wqkv_ref[l],
                      preferred_element_type=jnp.float32) + bqkv_ref[l]   # (SEQ, 3D)

        ctx_heads = []
        for hh in range(N_HEADS):                                   # static unroll
            off = hh * HEAD_DIM
            qh = qkv[:, off:off + HEAD_DIM]
            kh = qkv[:, D_MODEL + off:D_MODEL + off + HEAD_DIM]
            vh = qkv[:, 2 * D_MODEL + off:2 * D_MODEL + off + HEAD_DIM]
            # q @ k^T without materializing a transpose.
            s = jax.lax.dot_general(qh, kh, (((1,), (1,)), ((), ())),
                                    preferred_element_type=jnp.float32) * scale
            s = s - jnp.max(s, axis=-1, keepdims=True)
            p = jnp.exp(s)
            # approx reciprocal -> rows sum to ~1 (fine for inference).
            p = p * pl.reciprocal(jnp.sum(p, axis=-1, keepdims=True), approx=True)
            ctx_heads.append(jnp.dot(p, vh, preferred_element_type=jnp.float32))
        ctx = jnp.concatenate(ctx_heads, axis=-1)                    # (SEQ, D)

        # fused output projection
        attn = jnp.dot(ctx, wo_ref[l],
                       preferred_element_type=jnp.float32) + bo_ref[l]

        # ---- residual + LayerNorm 1 (post-norm, PyTorch default) ----
        h1 = x + attn
        mu = jnp.mean(h1, axis=-1, keepdims=True)
        var = jnp.mean((h1 - mu) ** 2, axis=-1, keepdims=True)
        h1 = (h1 - mu) * jax.lax.rsqrt(var + LN_EPS) * g1_ref[l] + be1_ref[l]

        # ---- feed-forward (relu) ----
        ff = jnp.dot(h1, w1_ref[l], preferred_element_type=jnp.float32) + b1_ref[l]
        ff = jnp.maximum(ff, 0.0)
        ff = jnp.dot(ff, w2_ref[l], preferred_element_type=jnp.float32) + b2_ref[l]

        # ---- residual + LayerNorm 2 ----
        h2 = h1 + ff
        mu2 = jnp.mean(h2, axis=-1, keepdims=True)
        var2 = jnp.mean((h2 - mu2) ** 2, axis=-1, keepdims=True)
        h = (h2 - mu2) * jax.lax.rsqrt(var2 + LN_EPS) * g2_ref[l] + be2_ref[l]

    # ---- unpatch embedding (conv_transpose3d-as-matmul, lane-dense) + sigmoid ----
    y = jnp.dot(h, up_w_ref[...], preferred_element_type=jnp.float32) + up_b_ref[...]
    o_ref[...] = jax.nn.sigmoid(y)                                   # (SEQ, 128)


# --------------------------- pallas_call wrapper ------------------------------
def _rep_spec(shape):
    # Whole-array block; same block index every grid step (no re-fetch).
    zeros = (0,) * len(shape)
    return pl.BlockSpec(shape, lambda b, zeros=zeros: zeros)


def vit_pallas(patches_flat, params):
    M = patches_flat.shape[0]
    B = M // SEQ
    weight_args = [params[k] for k in (
        "pe_w", "pe_b", "pos", "wqkv", "bqkv", "wo", "bo",
        "g1", "be1", "w1", "b1", "w2", "b2", "g2", "be2", "up_w", "up_b")]
    in_specs = [pl.BlockSpec((SEQ, P3), lambda b: (b, 0))] + \
               [_rep_spec(a.shape) for a in weight_args]
    return pl.pallas_call(
        vit_fused_kernel,
        out_shape=jax.ShapeDtypeStruct((M, OUT_LANES), jnp.float32),
        grid=(B,),
        in_specs=in_specs,
        out_specs=pl.BlockSpec((SEQ, OUT_LANES), lambda b: (b, 0)),
        compiler_params=pltpu.CompilerParams(
            dimension_semantics=("parallel",)),
    )(patches_flat, *weight_args)


# --------------------------- glue (plain JAX) ---------------------------------
def volume_to_patches(x):
    # x: (B, D, H, W)  ->  (B, SEQ, P3), seq ordered as (d_patch, h_patch, w_patch)
    B, D, H, W = x.shape
    p = PATCH
    x = x.reshape(B, D // p, p, H // p, p, W // p, p)
    x = x.transpose(0, 1, 3, 5, 2, 4, 6)                  # (B, Dp, Hp, Wp, p, p, p)
    return x.reshape(B, SEQ, P3)


def patches_to_volume(x):
    # x: (B, SEQ, P3) -> (B, D, H, W)
    B = x.shape[0]
    p = PATCH
    dp, hp, wp = SHAPE[0] // p, SHAPE[1] // p, SHAPE[2] // p
    x = x.reshape(B, dp, hp, wp, p, p, p)
    x = x.transpose(0, 1, 4, 2, 5, 3, 6)                  # (B, Dp, p, Hp, p, Wp, p)
    return x.reshape(B, SHAPE[0], SHAPE[1], SHAPE[2])


def central_cutout(x):
    sd = (SHAPE[0] - OUTPUT_SHAPE[0]) // 2
    sh = (SHAPE[1] - OUTPUT_SHAPE[1]) // 2
    sw = (SHAPE[2] - OUTPUT_SHAPE[2]) // 2
    return x[:, sd:sd + OUTPUT_SHAPE[0],
             sh:sh + OUTPUT_SHAPE[1],
             sw:sw + OUTPUT_SHAPE[2]]


@jax.jit
def vit_forward(x, params):
    B = x.shape[0]
    patches = volume_to_patches(x).reshape(B * SEQ, P3)           # (B*SEQ, P3)
    out_pad = vit_pallas(patches, params)                         # (B*SEQ, 128)
    out = out_pad[:, :P3]                                         # (B*SEQ, P3)
    vol = patches_to_volume(out.reshape(B, SEQ, P3))              # (B, D, H, W)
    # sigmoid(cutout(x)) == cutout(sigmoid(x)); sigmoid applied in-kernel.
    return central_cutout(vol)


# --------------------------- parameter init -----------------------------------
def init_params(key):
    n_keys = 3 + 8 * N_LAYERS + 2
    ks = iter(jax.random.split(key, n_keys))
    nrm = lambda shp, s=0.02: jax.random.normal(next(ks), shp, jnp.float32) * s

    # PatchEmbeddings: Conv3d(1, d_model, kernel=patch, stride=patch)
    conv_w = nrm((D_MODEL, 1, PATCH, PATCH, PATCH))                # torch layout
    pe_w = conv_w.reshape(D_MODEL, P3).T                           # (P3, D)
    pe_b = nrm((1, D_MODEL))

    # LearnedPositionalEmbeddings (max_len = n_patches**3 == SEQ)
    pos = nrm((SEQ, D_MODEL))

    wqkv_l, bqkv_l, wo_l, bo_l = [], [], [], []
    g1_l, be1_l, w1_l, b1_l, w2_l, b2_l, g2_l, be2_l = ([] for _ in range(8))

    for _ in range(N_LAYERS):
        in_proj_w = nrm((3 * D_MODEL, D_MODEL))                    # torch (3D, D)
        in_proj_b = nrm((3 * D_MODEL,))
        out_proj_w = nrm((D_MODEL, D_MODEL))                       # torch (D, D)
        out_proj_b = nrm((D_MODEL,))
        w1 = nrm((DIM_FF, D_MODEL))                                # torch (FF, D)
        b1 = nrm((DIM_FF,))
        w2 = nrm((D_MODEL, DIM_FF))                                # torch (D, FF)
        b2 = nrm((D_MODEL,))

        # Fused, lane-dense packing: x @ wqkv gives [Q | K | V] on lanes,
        # heads in natural order inside each 32-lane group.
        wqkv_l.append(in_proj_w.T)                                 # (D, 3D)
        bqkv_l.append(in_proj_b.reshape(1, 3 * D_MODEL))           # (1, 3D)
        wo_l.append(out_proj_w.T)                                  # (D, D): ctx @ Wo^T
        bo_l.append(out_proj_b.reshape(1, D_MODEL))
        g1_l.append(jnp.ones((1, D_MODEL), jnp.float32))
        be1_l.append(jnp.zeros((1, D_MODEL), jnp.float32))
        w1_l.append(w1.T)                                          # (D, FF)
        b1_l.append(b1.reshape(1, DIM_FF))
        w2_l.append(w2.T)                                          # (FF, D)
        b2_l.append(b2.reshape(1, D_MODEL))
        g2_l.append(jnp.ones((1, D_MODEL), jnp.float32))
        be2_l.append(jnp.zeros((1, D_MODEL), jnp.float32))

    # UnpatchEmbeddings: ConvTranspose3d(d_model, 1, kernel=patch, stride=patch)
    deconv_w = nrm((D_MODEL, 1, PATCH, PATCH, PATCH))              # torch layout
    up_w_core = deconv_w.reshape(D_MODEL, P3)                      # (D, P3)
    up_w = jnp.zeros((D_MODEL, OUT_LANES), jnp.float32)
    up_w = up_w.at[:, :P3].set(up_w_core)                          # lane-dense pad
    up_bias_scalar = nrm((1,))[0]
    up_b = jnp.zeros((1, OUT_LANES), jnp.float32).at[:, :P3].set(up_bias_scalar)

    stk = jnp.stack
    return dict(
        pe_w=pe_w, pe_b=pe_b, pos=pos,
        wqkv=stk(wqkv_l), bqkv=stk(bqkv_l),                        # (L, D, 3D), (L, 1, 3D)
        wo=stk(wo_l), bo=stk(bo_l),                                # (L, D, D),  (L, 1, D)
        g1=stk(g1_l), be1=stk(be1_l),
        w1=stk(w1_l), b1=stk(b1_l),
        w2=stk(w2_l), b2=stk(b2_l),
        g2=stk(g2_l), be2=stk(be2_l),
        up_w=up_w, up_b=up_b,                                      # (D, 128), (1, 128)
    )


# ------------------------------ main ------------------------------------------
if __name__ == "__main__":
    key = jax.random.PRNGKey(0)
    k_x, k_p = jax.random.split(key)
    x = jax.random.normal(k_x, (BATCH,) + SHAPE, dtype=jnp.float32)
    params = init_params(k_p)

    out = vit_forward(x, params)
    out = jax.block_until_ready(out)

    assert out.shape == (BATCH,) + OUTPUT_SHAPE, out.shape
    assert bool(jnp.all(jnp.isfinite(out)))
    assert bool(jnp.all((out >= 0.0) & (out <= 1.0)))   # sigmoid range
    print("KERNEL_OK")
</pallas_src>

<mosaic_0001>
module attributes {stable_mosaic.version = 11 : i64} {
  func.func @vit_fused_kernel(%arg0: i32, %arg1: memref<8x64xf32, #tpu.memory_space<vmem>>, %arg2: memref<64x32xf32, #tpu.memory_space<vmem>>, %arg3: memref<1x32xf32, #tpu.memory_space<vmem>>, %arg4: memref<8x32xf32, #tpu.memory_space<vmem>>, %arg5: memref<2x32x96xf32, #tpu.memory_space<vmem>>, %arg6: memref<2x1x96xf32, #tpu.memory_space<vmem>>, %arg7: memref<2x32x32xf32, #tpu.memory_space<vmem>>, %arg8: memref<2x1x32xf32, #tpu.memory_space<vmem>>, %arg9: memref<2x1x32xf32, #tpu.memory_space<vmem>>, %arg10: memref<2x1x32xf32, #tpu.memory_space<vmem>>, %arg11: memref<2x32x64xf32, #tpu.memory_space<vmem>>, %arg12: memref<2x1x64xf32, #tpu.memory_space<vmem>>, %arg13: memref<2x64x32xf32, #tpu.memory_space<vmem>>, %arg14: memref<2x1x32xf32, #tpu.memory_space<vmem>>, %arg15: memref<2x1x32xf32, #tpu.memory_space<vmem>>, %arg16: memref<2x1x32xf32, #tpu.memory_space<vmem>>, %arg17: memref<32x128xf32, #tpu.memory_space<vmem>>, %arg18: memref<1x128xf32, #tpu.memory_space<vmem>>, %arg19: memref<8x128xf32, #tpu.memory_space<vmem>>) attributes {dimension_semantics = [#tpu.dimension_semantics<parallel>], iteration_bounds = array<i64: 2>, scalar_prefetch = 0 : i64, scratch_operands = 0 : i64, tpu.core_type = #tpu.core_type<tc>, window_params = [{transform_indices = @transform_0, window_bounds = array<i64: 8, 64>}, {pipeline_mode = #tpu.pipeline_mode<synchronous>, transform_indices = @transform_1, window_bounds = array<i64: 64, 32>}, {pipeline_mode = #tpu.pipeline_mode<synchronous>, transform_indices = @transform_2, window_bounds = array<i64: 1, 32>}, {pipeline_mode = #tpu.pipeline_mode<synchronous>, transform_indices = @transform_3, window_bounds = array<i64: 8, 32>}, {pipeline_mode = #tpu.pipeline_mode<synchronous>, transform_indices = @transform_4, window_bounds = array<i64: 2, 32, 96>}, {pipeline_mode = #tpu.pipeline_mode<synchronous>, transform_indices = @transform_5, window_bounds = array<i64: 2, 1, 96>}, {pipeline_mode = #tpu.pipeline_mode<synchronous>, transform_indices = @transform_6, window_bounds = array<i64: 2, 32, 32>}, {pipeline_mode = #tpu.pipeline_mode<synchronous>, transform_indices = @transform_7, window_bounds = array<i64: 2, 1, 32>}, {pipeline_mode = #tpu.pipeline_mode<synchronous>, transform_indices = @transform_8, window_bounds = array<i64: 2, 1, 32>}, {pipeline_mode = #tpu.pipeline_mode<synchronous>, transform_indices = @transform_9, window_bounds = array<i64: 2, 1, 32>}, {pipeline_mode = #tpu.pipeline_mode<synchronous>, transform_indices = @transform_10, window_bounds = array<i64: 2, 32, 64>}, {pipeline_mode = #tpu.pipeline_mode<synchronous>, transform_indices = @transform_11, window_bounds = array<i64: 2, 1, 64>}, {pipeline_mode = #tpu.pipeline_mode<synchronous>, transform_indices = @transform_12, window_bounds = array<i64: 2, 64, 32>}, {pipeline_mode = #tpu.pipeline_mode<synchronous>, transform_indices = @transform_13, window_bounds = array<i64: 2, 1, 32>}, {pipeline_mode = #tpu.pipeline_mode<synchronous>, transform_indices = @transform_14, window_bounds = array<i64: 2, 1, 32>}, {pipeline_mode = #tpu.pipeline_mode<synchronous>, transform_indices = @transform_15, window_bounds = array<i64: 2, 1, 32>}, {pipeline_mode = #tpu.pipeline_mode<synchronous>, transform_indices = @transform_16, window_bounds = array<i64: 32, 128>}, {pipeline_mode = #tpu.pipeline_mode<synchronous>, transform_indices = @transform_17, window_bounds = array<i64: 1, 128>}, {transform_indices = @transform_18, window_bounds = array<i64: 8, 128>}]} {
    %c0 = arith.constant 0 : index
    %c0_0 = arith.constant 0 : index
    %0 = vector.load %arg1[%c0, %c0_0] : memref<8x64xf32, #tpu.memory_space<vmem>>, vector<8x64xf32>
    %c0_1 = arith.constant 0 : index
    %c0_2 = arith.constant 0 : index
    %1 = vector.load %arg2[%c0_1, %c0_2] : memref<64x32xf32, #tpu.memory_space<vmem>>, vector<64x32xf32>
    %cst = arith.constant dense<0.000000e+00> : vector<8x32xf32>
    %2 = tpu.matmul %0, %1, %cst {dimension_numbers = #tpu.dot_dimension_numbers<[1], [0], [0], [1], [0, 0, 1, 1], [], []>} : vector<8x64xf32>, vector<64x32xf32>, vector<8x32xf32> -> vector<8x32xf32>
    %c0_3 = arith.constant 0 : index
    %c0_4 = arith.constant 0 : index
    %3 = vector.load %arg3[%c0_3, %c0_4] : memref<1x32xf32, #tpu.memory_space<vmem>>, vector<1x32xf32>
    %c0_5 = arith.constant 0 : index
    %c0_6 = arith.constant 0 : index
    %4 = vector.load %arg4[%c0_5, %c0_6] : memref<8x32xf32, #tpu.memory_space<vmem>>, vector<8x32xf32>
    %5 = vector.broadcast %3 : vector<1x32xf32> to vector<8x32xf32>
    %6 = arith.addf %5, %4 : vector<8x32xf32>
    %7 = arith.addf %2, %6 : vector<8x32xf32>
    %c0_7 = arith.constant 0 : index
    %c0_8 = arith.constant 0 : index
    %c0_9 = arith.constant 0 : index
    %8 = vector.load %arg5[%c0_7, %c0_8, %c0_9] : memref<2x32x96xf32, #tpu.memory_space<vmem>>, vector<1x32x96xf32>
    %9 = vector.shape_cast %8 : vector<1x32x96xf32> to vector<32x96xf32>
    %cst_10 = arith.constant dense<0.000000e+00> : vector<8x96xf32>
    %10 = tpu.matmul %7, %9, %cst_10 {dimension_numbers = #tpu.dot_dimension_numbers<[1], [0], [0], [1], [0, 0, 1, 1], [], []>} : vector<8x32xf32>, vector<32x96xf32>, vector<8x96xf32> -> vector<8x96xf32>
    %c0_11 = arith.constant 0 : index
    %c0_12 = arith.constant 0 : index
    %c0_13 = arith.constant 0 : index
    %11 = vector.load %arg6[%c0_11, %c0_12, %c0_13] : memref<2x1x96xf32, #tpu.memory_space<vmem>>, vector<1x1x96xf32>
    %12 = vector.shape_cast %11 : vector<1x1x96xf32> to vector<1x96xf32>
    %13 = vector.broadcast %12 : vector<1x96xf32> to vector<8x96xf32>
    %14 = arith.addf %10, %13 : vector<8x96xf32>
    %15 = vector.extract_strided_slice %14 {offsets = [0, 0], sizes = [8, 8], strides = [1, 1]} : vector<8x96xf32> to vector<8x8xf32>
    %16 = vector.extract_strided_slice %14 {offsets = [0, 32], sizes = [8, 8], strides = [1, 1]} : vector<8x96xf32> to vector<8x8xf32>
    %17 = vector.extract_strided_slice %14 {offsets = [0, 64], sizes = [8, 8], strides = [1, 1]} : vector<8x96xf32> to vector<8x8xf32>
    %cst_14 = arith.constant dense<0.000000e+00> : vector<8x8xf32>
    %18 = tpu.matmul %15, %16, %cst_14 {dimension_numbers = #tpu.dot_dimension_numbers<[1], [1], [0], [0], [0, 0, 1, 0], [], []>} : vector<8x8xf32>, vector<8x8xf32>, vector<8x8xf32> -> vector<8x8xf32>
    %cst_15 = arith.constant 0.353553385 : f32
    %19 = vector.broadcast %cst_15 : f32 to vector<8x8xf32>
    %20 = arith.mulf %18, %19 : vector<8x8xf32>
    %cst_16 = arith.constant dense<0xFF800000> : vector<8xf32>
    %21 = vector.multi_reduction <maximumf>, %20, %cst_16 [1] : vector<8x8xf32> to vector<8xf32>
    %22 = vector.shape_cast %21 : vector<8xf32> to vector<8x1xf32>
    %23 = vector.broadcast %22 : vector<8x1xf32> to vector<8x8xf32>
    %24 = arith.subf %20, %23 : vector<8x8xf32>
    %25 = math.exp %24 : vector<8x8xf32>
    %cst_17 = arith.constant dense<0.000000e+00> : vector<8xf32>
    %26 = vector.multi_reduction <add>, %25, %cst_17 [1] : vector<8x8xf32> to vector<8xf32>
    %27 = vector.shape_cast %26 : vector<8xf32> to vector<8x1xf32>
    %28 = tpu.reciprocal %27 {approx = true} : vector<8x1xf32> -> vector<8x1xf32>
    %29 = vector.broadcast %28 : vector<8x1xf32> to vector<8x8xf32>
    %30 = arith.mulf %25, %29 : vector<8x8xf32>
    %cst_18 = arith.constant dense<0.000000e+00> : vector<8x8xf32>
    %31 = tpu.matmul %30, %17, %cst_18 {dimension_numbers = #tpu.dot_dimension_numbers<[1], [0], [0], [1], [0, 0, 1, 1], [], []>} : vector<8x8xf32>, vector<8x8xf32>, vector<8x8xf32> -> vector<8x8xf32>
    %32 = vector.extract_strided_slice %14 {offsets = [0, 8], sizes = [8, 8], strides = [1, 1]} : vector<8x96xf32> to vector<8x8xf32>
    %33 = vector.extract_strided_slice %14 {offsets = [0, 40], sizes = [8, 8], strides = [1, 1]} : vector<8x96xf32> to vector<8x8xf32>
    %34 = vector.extract_strided_slice %14 {offsets = [0, 72], sizes = [8, 8], strides = [1, 1]} : vector<8x96xf32> to vector<8x8xf32>
    %cst_19 = arith.constant dense<0.000000e+00> : vector<8x8xf32>
    %35 = tpu.matmul %32, %33, %cst_19 {dimension_numbers = #tpu.dot_dimension_numbers<[1], [1], [0], [0], [0, 0, 1, 0], [], []>} : vector<8x8xf32>, vector<8x8xf32>, vector<8x8xf32> -> vector<8x8xf32>
    %cst_20 = arith.constant 0.353553385 : f32
    %36 = vector.broadcast %cst_20 : f32 to vector<8x8xf32>
    %37 = arith.mulf %35, %36 : vector<8x8xf32>
    %cst_21 = arith.constant dense<0xFF800000> : vector<8xf32>
    %38 = vector.multi_reduction <maximumf>, %37, %cst_21 [1] : vector<8x8xf32> to vector<8xf32>
    %39 = vector.shape_cast %38 : vector<8xf32> to vector<8x1xf32>
    %40 = vector.broadcast %39 : vector<8x1xf32> to vector<8x8xf32>
    %41 = arith.subf %37, %40 : vector<8x8xf32>
    %42 = math.exp %41 : vector<8x8xf32>
    %cst_22 = arith.constant dense<0.000000e+00> : vector<8xf32>
    %43 = vector.multi_reduction <add>, %42, %cst_22 [1] : vector<8x8xf32> to vector<8xf32>
    %44 = vector.shape_cast %43 : vector<8xf32> to vector<8x1xf32>
    %45 = tpu.reciprocal %44 {approx = true} : vector<8x1xf32> -> vector<8x1xf32>
    %46 = vector.broadcast %45 : vector<8x1xf32> to vector<8x8xf32>
    %47 = arith.mulf %42, %46 : vector<8x8xf32>
    %cst_23 = arith.constant dense<0.000000e+00> : vector<8x8xf32>
    %48 = tpu.matmul %47, %34, %cst_23 {dimension_numbers = #tpu.dot_dimension_numbers<[1], [0], [0], [1], [0, 0, 1, 1], [], []>} : vector<8x8xf32>, vector<8x8xf32>, vector<8x8xf32> -> vector<8x8xf32>
    %49 = vector.extract_strided_slice %14 {offsets = [0, 16], sizes = [8, 8], strides = [1, 1]} : vector<8x96xf32> to vector<8x8xf32>
    %50 = vector.extract_strided_slice %14 {offsets = [0, 48], sizes = [8, 8], strides = [1, 1]} : vector<8x96xf32> to vector<8x8xf32>
    %51 = vector.extract_strided_slice %14 {offsets = [0, 80], sizes = [8, 8], strides = [1, 1]} : vector<8x96xf32> to vector<8x8xf32>
    %cst_24 = arith.constant dense<0.000000e+00> : vector<8x8xf32>
    %52 = tpu.matmul %49, %50, %cst_24 {dimension_numbers = #tpu.dot_dimension_numbers<[1], [1], [0], [0], [0, 0, 1, 0], [], []>} : vector<8x8xf32>, vector<8x8xf32>, vector<8x8xf32> -> vector<8x8xf32>
    %cst_25 = arith.constant 0.353553385 : f32
    %53 = vector.broadcast %cst_25 : f32 to vector<8x8xf32>
    %54 = arith.mulf %52, %53 : vector<8x8xf32>
    %cst_26 = arith.constant dense<0xFF800000> : vector<8xf32>
    %55 = vector.multi_reduction <maximumf>, %54, %cst_26 [1] : vector<8x8xf32> to vector<8xf32>
    %56 = vector.shape_cast %55 : vector<8xf32> to vector<8x1xf32>
    %57 = vector.broadcast %56 : vector<8x1xf32> to vector<8x8xf32>
    %58 = arith.subf %54, %57 : vector<8x8xf32>
    %59 = math.exp %58 : vector<8x8xf32>
    %cst_27 = arith.constant dense<0.000000e+00> : vector<8xf32>
    %60 = vector.multi_reduction <add>, %59, %cst_27 [1] : vector<8x8xf32> to vector<8xf32>
    %61 = vector.shape_cast %60 : vector<8xf32> to vector<8x1xf32>
    %62 = tpu.reciprocal %61 {approx = true} : vector<8x1xf32> -> vector<8x1xf32>
    %63 = vector.broadcast %62 : vector<8x1xf32> to vector<8x8xf32>
    %64 = arith.mulf %59, %63 : vector<8x8xf32>
    %cst_28 = arith.constant dense<0.000000e+00> : vector<8x8xf32>
    %65 = tpu.matmul %64, %51, %cst_28 {dimension_numbers = #tpu.dot_dimension_numbers<[1], [0], [0], [1], [0, 0, 1, 1], [], []>} : vector<8x8xf32>, vector<8x8xf32>, vector<8x8xf32> -> vector<8x8xf32>
    %66 = vector.extract_strided_slice %14 {offsets = [0, 24], sizes = [8, 8], strides = [1, 1]} : vector<8x96xf32> to vector<8x8xf32>
    %67 = vector.extract_strided_slice %14 {offsets = [0, 56], sizes = [8, 8], strides = [1, 1]} : vector<8x96xf32> to vector<8x8xf32>
    %68 = vector.extract_strided_slice %14 {offsets = [0, 88], sizes = [8, 8], strides = [1, 1]} : vector<8x96xf32> to vector<8x8xf32>
    %cst_29 = arith.constant dense<0.000000e+00> : vector<8x8xf32>
    %69 = tpu.matmul %66, %67, %cst_29 {dimension_numbers = #tpu.dot_dimension_numbers<[1], [1], [0], [0], [0, 0, 1, 0], [], []>} : vector<8x8xf32>, vector<8x8xf32>, vector<8x8xf32> -> vector<8x8xf32>
    %cst_30 = arith.constant 0.353553385 : f32
    %70 = vector.broadcast %cst_30 : f32 to vector<8x8xf32>
    %71 = arith.mulf %69, %70 : vector<8x8xf32>
    %cst_31 = arith.constant dense<0xFF800000> : vector<8xf32>
    %72 = vector.multi_reduction <maximumf>, %71, %cst_31 [1] : vector<8x8xf32> to vector<8xf32>
    %73 = vector.shape_cast %72 : vector<8xf32> to vector<8x1xf32>
    %74 = vector.broadcast %73 : vector<8x1xf32> to vector<8x8xf32>
    %75 = arith.subf %71, %74 : vector<8x8xf32>
    %76 = math.exp %75 : vector<8x8xf32>
    %cst_32 = arith.constant dense<0.000000e+00> : vector<8xf32>
    %77 = vector.multi_reduction <add>, %76, %cst_32 [1] : vector<8x8xf32> to vector<8xf32>
    %78 = vector.shape_cast %77 : vector<8xf32> to vector<8x1xf32>
    %79 = tpu.reciprocal %78 {approx = true} : vector<8x1xf32> -> vector<8x1xf32>
    %80 = vector.broadcast %79 : vector<8x1xf32> to vector<8x8xf32>
    %81 = arith.mulf %76, %80 : vector<8x8xf32>
    %cst_33 = arith.constant dense<0.000000e+00> : vector<8x8xf32>
    %82 = tpu.matmul %81, %68, %cst_33 {dimension_numbers = #tpu.dot_dimension_numbers<[1], [0], [0], [1], [0, 0, 1, 1], [], []>} : vector<8x8xf32>, vector<8x8xf32>, vector<8x8xf32> -> vector<8x8xf32>
    %83 = tpu.concatenate %31, %48, %65, %82 in 1 : vector<8x8xf32>, vector<8x8xf32>, vector<8x8xf32>, vector<8x8xf32> -> vector<8x32xf32>
    %c0_34 = arith.constant 0 : index
    %c0_35 = arith.constant 0 : index
    %c0_36 = arith.constant 0 : index
    %84 = vector.load %arg7[%c0_34, %c0_35, %c0_36] : memref<2x32x32xf32, #tpu.memory_space<vmem>>, vector<1x32x32xf32>
    %85 = vector.shape_cast %84 : vector<1x32x32xf32> to vector<32x32xf32>
    %cst_37 = arith.constant dense<0.000000e+00> : vector<8x32xf32>
    %86 = tpu.matmul %83, %85, %cst_37 {dimension_numbers = #tpu.dot_dimension_numbers<[1], [0], [0], [1], [0, 0, 1, 1], [], []>} : vector<8x32xf32>, vector<32x32xf32>, vector<8x32xf32> -> vector<8x32xf32>
    %c0_38 = arith.constant 0 : index
    %c0_39 = arith.constant 0 : index
    %c0_40 = arith.constant 0 : index
    %87 = vector.load %arg8[%c0_38, %c0_39, %c0_40] : memref<2x1x32xf32, #tpu.memory_space<vmem>>, vector<1x1x32xf32>
    %88 = vector.shape_cast %87 : vector<1x1x32xf32> to vector<1x32xf32>
    %89 = vector.broadcast %88 : vector<1x32xf32> to vector<8x32xf32>
    %90 = arith.addf %86, %89 : vector<8x32xf32>
    %91 = arith.addf %7, %90 : vector<8x32xf32>
    %cst_41 = arith.constant dense<0.000000e+00> : vector<8xf32>
    %92 = vector.multi_reduction <add>, %91, %cst_41 [1] : vector<8x32xf32> to vector<8xf32>
    %93 = vector.shape_cast %92 : vector<8xf32> to vector<8x1xf32>
    %cst_42 = arith.constant 3.200000e+01 : f32
    %94 = vector.broadcast %cst_42 : f32 to vector<8x1xf32>
    %95 = arith.divf %93, %94 : vector<8x1xf32>
    %96 = vector.broadcast %95 : vector<8x1xf32> to vector<8x32xf32>
    %97 = arith.subf %91, %96 : vector<8x32xf32>
    %98 = arith.mulf %97, %97 : vector<8x32xf32>
    %cst_43 = arith.constant dense<0.000000e+00> : vector<8xf32>
    %99 = vector.multi_reduction <add>, %98, %cst_43 [1] : vector<8x32xf32> to vector<8xf32>
    %100 = vector.shape_cast %99 : vector<8xf32> to vector<8x1xf32>
    %cst_44 = arith.constant 3.200000e+01 : f32
    %101 = vector.broadcast %cst_44 : f32 to vector<8x1xf32>
    %102 = arith.divf %100, %101 : vector<8x1xf32>
    %103 = vector.broadcast %95 : vector<8x1xf32> to vector<8x32xf32>
    %104 = arith.subf %91, %103 : vector<8x32xf32>
    %cst_45 = arith.constant 9.99999974E-6 : f32
    %105 = vector.broadcast %cst_45 : f32 to vector<8x1xf32>
    %106 = arith.addf %102, %105 : vector<8x1xf32>
    %107 = math.rsqrt %106 : vector<8x1xf32>
    %108 = vector.broadcast %107 : vector<8x1xf32> to vector<8x32xf32>
    %109 = arith.mulf %104, %108 : vector<8x32xf32>
    %c0_46 = arith.constant 0 : index
    %c0_47 = arith.constant 0 : index
    %c0_48 = arith.constant 0 : index
    %110 = vector.load %arg9[%c0_46, %c0_47, %c0_48] : memref<2x1x32xf32, #tpu.memory_space<vmem>>, vector<1x1x32xf32>
    %111 = vector.shape_cast %110 : vector<1x1x32xf32> to vector<1x32xf32>
    %112 = vector.broadcast %111 : vector<1x32xf32> to vector<8x32xf32>
    %113 = arith.mulf %109, %112 : vector<8x32xf32>
    %c0_49 = arith.constant 0 : index
    %c0_50 = arith.constant 0 : index
    %c0_51 = arith.constant 0 : index
    %114 = vector.load %arg10[%c0_49, %c0_50, %c0_51] : memref<2x1x32xf32, #tpu.memory_space<vmem>>, vector<1x1x32xf32>
    %115 = vector.shape_cast %114 : vector<1x1x32xf32> to vector<1x32xf32>
    %116 = vector.broadcast %115 : vector<1x32xf32> to vector<8x32xf32>
    %117 = arith.addf %113, %116 : vector<8x32xf32>
    %c0_52 = arith.constant 0 : index
    %c0_53 = arith.constant 0 : index
    %c0_54 = arith.constant 0 : index
    %118 = vector.load %arg11[%c0_52, %c0_53, %c0_54] : memref<2x32x64xf32, #tpu.memory_space<vmem>>, vector<1x32x64xf32>
    %119 = vector.shape_cast %118 : vector<1x32x64xf32> to vector<32x64xf32>
    %cst_55 = arith.constant dense<0.000000e+00> : vector<8x64xf32>
    %120 = tpu.matmul %117, %119, %cst_55 {dimension_numbers = #tpu.dot_dimension_numbers<[1], [0], [0], [1], [0, 0, 1, 1], [], []>} : vector<8x32xf32>, vector<32x64xf32>, vector<8x64xf32> -> vector<8x64xf32>
    %c0_56 = arith.constant 0 : index
    %c0_57 = arith.constant 0 : index
    %c0_58 = arith.constant 0 : index
    %121 = vector.load %arg12[%c0_56, %c0_57, %c0_58] : memref<2x1x64xf32, #tpu.memory_space<vmem>>, vector<1x1x64xf32>
    %122 = vector.shape_cast %121 : vector<1x1x64xf32> to vector<1x64xf32>
    %123 = vector.broadcast %122 : vector<1x64xf32> to vector<8x64xf32>
    %124 = arith.addf %120, %123 : vector<8x64xf32>
    %cst_59 = arith.constant 0.000000e+00 : f32
    %125 = vector.broadcast %cst_59 : f32 to vector<8x64xf32>
    %126 = arith.maximumf %124, %125 : vector<8x64xf32>
    %c0_60 = arith.constant 0 : index
    %c0_61 = arith.constant 0 : index
    %c0_62 = arith.constant 0 : index
    %127 = vector.load %arg13[%c0_60, %c0_61, %c0_62] : memref<2x64x32xf32, #tpu.memory_space<vmem>>, vector<1x64x32xf32>
    %128 = vector.shape_cast %127 : vector<1x64x32xf32> to vector<64x32xf32>
    %cst_63 = arith.constant dense<0.000000e+00> : vector<8x32xf32>
    %129 = tpu.matmul %126, %128, %cst_63 {dimension_numbers = #tpu.dot_dimension_numbers<[1], [0], [0], [1], [0, 0, 1, 1], [], []>} : vector<8x64xf32>, vector<64x32xf32>, vector<8x32xf32> -> vector<8x32xf32>
    %c0_64 = arith.constant 0 : index
    %c0_65 = arith.constant 0 : index
    %c0_66 = arith.constant 0 : index
    %130 = vector.load %arg14[%c0_64, %c0_65, %c0_66] : memref<2x1x32xf32, #tpu.memory_space<vmem>>, vector<1x1x32xf32>
    %131 = vector.shape_cast %130 : vector<1x1x32xf32> to vector<1x32xf32>
    %132 = vector.broadcast %131 : vector<1x32xf32> to vector<8x32xf32>
    %133 = arith.addf %129, %132 : vector<8x32xf32>
    %134 = arith.addf %117, %133 : vector<8x32xf32>
    %cst_67 = arith.constant dense<0.000000e+00> : vector<8xf32>
    %135 = vector.multi_reduction <add>, %134, %cst_67 [1] : vector<8x32xf32> to vector<8xf32>
    %136 = vector.shape_cast %135 : vector<8xf32> to vector<8x1xf32>
    %cst_68 = arith.constant 3.200000e+01 : f32
    %137 = vector.broadcast %cst_68 : f32 to vector<8x1xf32>
    %138 = arith.divf %136, %137 : vector<8x1xf32>
    %139 = vector.broadcast %138 : vector<8x1xf32> to vector<8x32xf32>
    %140 = arith.subf %134, %139 : vector<8x32xf32>
    %141 = arith.mulf %140, %140 : vector<8x32xf32>
    %cst_69 = arith.constant dense<0.000000e+00> : vector<8xf32>
    %142 = vector.multi_reduction <add>, %141, %cst_69 [1] : vector<8x32xf32> to vector<8xf32>
    %143 = vector.shape_cast %142 : vector<8xf32> to vector<8x1xf32>
    %cst_70 = arith.constant 3.200000e+01 : f32
    %144 = vector.broadcast %cst_70 : f32 to vector<8x1xf32>
    %145 = arith.divf %143, %144 : vector<8x1xf32>
    %146 = vector.broadcast %138 : vector<8x1xf32> to vector<8x32xf32>
    %147 = arith.subf %134, %146 : vector<8x32xf32>
    %cst_71 = arith.constant 9.99999974E-6 : f32
    %148 = vector.broadcast %cst_71 : f32 to vector<8x1xf32>
    %149 = arith.addf %145, %148 : vector<8x1xf32>
    %150 = math.rsqrt %149 : vector<8x1xf32>
    %151 = vector.broadcast %150 : vector<8x1xf32> to vector<8x32xf32>
    %152 = arith.mulf %147, %151 : vector<8x32xf32>
    %c0_72 = arith.constant 0 : index
    %c0_73 = arith.constant 0 : index
    %c0_74 = arith.constant 0 : index
    %153 = vector.load %arg15[%c0_72, %c0_73, %c0_74] : memref<2x1x32xf32, #tpu.memory_space<vmem>>, vector<1x1x32xf32>
    %154 = vector.shape_cast %153 : vector<1x1x32xf32> to vector<1x32xf32>
    %155 = vector.broadcast %154 : vector<1x32xf32> to vector<8x32xf32>
    %156 = arith.mulf %152, %155 : vector<8x32xf32>
    %c0_75 = arith.constant 0 : index
    %c0_76 = arith.constant 0 : index
    %c0_77 = arith.constant 0 : index
    %157 = vector.load %arg16[%c0_75, %c0_76, %c0_77] : memref<2x1x32xf32, #tpu.memory_space<vmem>>, vector<1x1x32xf32>
    %158 = vector.shape_cast %157 : vector<1x1x32xf32> to vector<1x32xf32>
    %159 = vector.broadcast %158 : vector<1x32xf32> to vector<8x32xf32>
    %160 = arith.addf %156, %159 : vector<8x32xf32>
    %c1 = arith.constant 1 : index
    %c0_78 = arith.constant 0 : index
    %c0_79 = arith.constant 0 : index
    %161 = vector.load %arg5[%c1, %c0_78, %c0_79] : memref<2x32x96xf32, #tpu.memory_space<vmem>>, vector<1x32x96xf32>
    %162 = vector.shape_cast %161 : vector<1x32x96xf32> to vector<32x96xf32>
    %cst_80 = arith.constant dense<0.000000e+00> : vector<8x96xf32>
    %163 = tpu.matmul %160, %162, %cst_80 {dimension_numbers = #tpu.dot_dimension_numbers<[1], [0], [0], [1], [0, 0, 1, 1], [], []>} : vector<8x32xf32>, vector<32x96xf32>, vector<8x96xf32> -> vector<8x96xf32>
    %c1_81 = arith.constant 1 : index
    %c0_82 = arith.constant 0 : index
    %c0_83 = arith.constant 0 : index
    %164 = vector.load %arg6[%c1_81, %c0_82, %c0_83] : memref<2x1x96xf32, #tpu.memory_space<vmem>>, vector<1x1x96xf32>
    %165 = vector.shape_cast %164 : vector<1x1x96xf32> to vector<1x96xf32>
    %166 = vector.broadcast %165 : vector<1x96xf32> to vector<8x96xf32>
    %167 = arith.addf %163, %166 : vector<8x96xf32>
    %168 = vector.extract_strided_slice %167 {offsets = [0, 0], sizes = [8, 8], strides = [1, 1]} : vector<8x96xf32> to vector<8x8xf32>
    %169 = vector.extract_strided_slice %167 {offsets = [0, 32], sizes = [8, 8], strides = [1, 1]} : vector<8x96xf32> to vector<8x8xf32>
    %170 = vector.extract_strided_slice %167 {offsets = [0, 64], sizes = [8, 8], strides = [1, 1]} : vector<8x96xf32> to vector<8x8xf32>
    %cst_84 = arith.constant dense<0.000000e+00> : vector<8x8xf32>
    %171 = tpu.matmul %168, %169, %cst_84 {dimension_numbers = #tpu.dot_dimension_numbers<[1], [1], [0], [0], [0, 0, 1, 0], [], []>} : vector<8x8xf32>, vector<8x8xf32>, vector<8x8xf32> -> vector<8x8xf32>
    %cst_85 = arith.constant 0.353553385 : f32
    %172 = vector.broadcast %cst_85 : f32 to vector<8x8xf32>
    %173 = arith.mulf %171, %172 : vector<8x8xf32>
    %cst_86 = arith.constant dense<0xFF800000> : vector<8xf32>
    %174 = vector.multi_reduction <maximumf>, %173, %cst_86 [1] : vector<8x8xf32> to vector<8xf32>
    %175 = vector.shape_cast %174 : vector<8xf32> to vector<8x1xf32>
    %176 = vector.broadcast %175 : vector<8x1xf32> to vector<8x8xf32>
    %177 = arith.subf %173, %176 : vector<8x8xf32>
    %178 = math.exp %177 : vector<8x8xf32>
    %cst_87 = arith.constant dense<0.000000e+00> : vector<8xf32>
    %179 = vector.multi_reduction <add>, %178, %cst_87 [1] : vector<8x8xf32> to vector<8xf32>
    %180 = vector.shape_cast %179 : vector<8xf32> to vector<8x1xf32>
    %181 = tpu.reciprocal %180 {approx = true} : vector<8x1xf32> -> vector<8x1xf32>
    %182 = vector.broadcast %181 : vector<8x1xf32> to vector<8x8xf32>
    %183 = arith.mulf %178, %182 : vector<8x8xf32>
    %cst_88 = arith.constant dense<0.000000e+00> : vector<8x8xf32>
    %184 = tpu.matmul %183, %170, %cst_88 {dimension_numbers = #tpu.dot_dimension_numbers<[1], [0], [0], [1], [0, 0, 1, 1], [], []>} : vector<8x8xf32>, vector<8x8xf32>, vector<8x8xf32> -> vector<8x8xf32>
    %185 = vector.extract_strided_slice %167 {offsets = [0, 8], sizes = [8, 8], strides = [1, 1]} : vector<8x96xf32> to vector<8x8xf32>
    %186 = vector.extract_strided_slice %167 {offsets = [0, 40], sizes = [8, 8], strides = [1, 1]} : vector<8x96xf32> to vector<8x8xf32>
    %187 = vector.extract_strided_slice %167 {offsets = [0, 72], sizes = [8, 8], strides = [1, 1]} : vector<8x96xf32> to vector<8x8xf32>
    %cst_89 = arith.constant dense<0.000000e+00> : vector<8x8xf32>
    %188 = tpu.matmul %185, %186, %cst_89 {dimension_numbers = #tpu.dot_dimension_numbers<[1], [1], [0], [0], [0, 0, 1, 0], [], []>} : vector<8x8xf32>, vector<8x8xf32>, vector<8x8xf32> -> vector<8x8xf32>
    %cst_90 = arith.constant 0.353553385 : f32
    %189 = vector.broadcast %cst_90 : f32 to vector<8x8xf32>
    %190 = arith.mulf %188, %189 : vector<8x8xf32>
    %cst_91 = arith.constant dense<0xFF800000> : vector<8xf32>
    %191 = vector.multi_reduction <maximumf>, %190, %cst_91 [1] : vector<8x8xf32> to vector<8xf32>
    %192 = vector.shape_cast %191 : vector<8xf32> to vector<8x1xf32>
    %193 = vector.broadcast %192 : vector<8x1xf32> to vector<8x8xf32>
    %194 = arith.subf %190, %193 : vector<8x8xf32>
    %195 = math.exp %194 : vector<8x8xf32>
    %cst_92 = arith.constant dense<0.000000e+00> : vector<8xf32>
    %196 = vector.multi_reduction <add>, %195, %cst_92 [1] : vector<8x8xf32> to vector<8xf32>
    %197 = vector.shape_cast %196 : vector<8xf32> to vector<8x1xf32>
    %198 = tpu.reciprocal %197 {approx = true} : vector<8x1xf32> -> vector<8x1xf32>
    %199 = vector.broadcast %198 : vector<8x1xf32> to vector<8x8xf32>
    %200 = arith.mulf %195, %199 : vector<8x8xf32>
    %cst_93 = arith.constant dense<0.000000e+00> : vector<8x8xf32>
    %201 = tpu.matmul %200, %187, %cst_93 {dimension_numbers = #tpu.dot_dimension_numbers<[1], [0], [0], [1], [0, 0, 1, 1], [], []>} : vector<8x8xf32>, vector<8x8xf32>, vector<8x8xf32> -> vector<8x8xf32>
    %202 = vector.extract_strided_slice %167 {offsets = [0, 16], sizes = [8, 8], strides = [1, 1]} : vector<8x96xf32> to vector<8x8xf32>
    %203 = vector.extract_strided_slice %167 {offsets = [0, 48], sizes = [8, 8], strides = [1, 1]} : vector<8x96xf32> to vector<8x8xf32>
    %204 = vector.extract_strided_slice %167 {offsets = [0, 80], sizes = [8, 8], strides = [1, 1]} : vector<8x96xf32> to vector<8x8xf32>
    %cst_94 = arith.constant dense<0.000000e+00> : vector<8x8xf32>
    %205 = tpu.matmul %202, %203, %cst_94 {dimension_numbers = #tpu.dot_dimension_numbers<[1], [1], [0], [0], [0, 0, 1, 0], [], []>} : vector<8x8xf32>, vector<8x8xf32>, vector<8x8xf32> -> vector<8x8xf32>
    %cst_95 = arith.constant 0.353553385 : f32
    %206 = vector.broadcast %cst_95 : f32 to vector<8x8xf32>
    %207 = arith.mulf %205, %206 : vector<8x8xf32>
    %cst_96 = arith.constant dense<0xFF800000> : vector<8xf32>
    %208 = vector.multi_reduction <maximumf>, %207, %cst_96 [1] : vector<8x8xf32> to vector<8xf32>
    %209 = vector.shape_cast %208 : vector<8xf32> to vector<8x1xf32>
    %210 = vector.broadcast %209 : vector<8x1xf32> to vector<8x8xf32>
    %211 = arith.subf %207, %210 : vector<8x8xf32>
    %212 = math.exp %211 : vector<8x8xf32>
    %cst_97 = arith.constant dense<0.000000e+00> : vector<8xf32>
    %213 = vector.multi_reduction <add>, %212, %cst_97 [1] : vector<8x8xf32> to vector<8xf32>
    %214 = vector.shape_cast %213 : vector<8xf32> to vector<8x1xf32>
    %215 = tpu.reciprocal %214 {approx = true} : vector<8x1xf32> -> vector<8x1xf32>
    %216 = vector.broadcast %215 : vector<8x1xf32> to vector<8x8xf32>
    %217 = arith.mulf %212, %216 : vector<8x8xf32>
    %cst_98 = arith.constant dense<0.000000e+00> : vector<8x8xf32>
    %218 = tpu.matmul %217, %204, %cst_98 {dimension_numbers = #tpu.dot_dimension_numbers<[1], [0], [0], [1], [0, 0, 1, 1], [], []>} : vector<8x8xf32>, vector<8x8xf32>, vector<8x8xf32> -> vector<8x8xf32>
    %219 = vector.extract_strided_slice %167 {offsets = [0, 24], sizes = [8, 8], strides = [1, 1]} : vector<8x96xf32> to vector<8x8xf32>
    %220 = vector.extract_strided_slice %167 {offsets = [0, 56], sizes = [8, 8], strides = [1, 1]} : vector<8x96xf32> to vector<8x8xf32>
    %221 = vector.extract_strided_slice %167 {offsets = [0, 88], sizes = [8, 8], strides = [1, 1]} : vector<8x96xf32> to vector<8x8xf32>
    %cst_99 = arith.constant dense<0.000000e+00> : vector<8x8xf32>
    %222 = tpu.matmul %219, %220, %cst_99 {dimension_numbers = #tpu.dot_dimension_numbers<[1], [1], [0], [0], [0, 0, 1, 0], [], []>} : vector<8x8xf32>, vector<8x8xf32>, vector<8x8xf32> -> vector<8x8xf32>
    %cst_100 = arith.constant 0.353553385 : f32
    %223 = vector.broadcast %cst_100 : f32 to vector<8x8xf32>
    %224 = arith.mulf %222, %223 : vector<8x8xf32>
    %cst_101 = arith.constant dense<0xFF800000> : vector<8xf32>
    %225 = vector.multi_reduction <maximumf>, %224, %cst_101 [1] : vector<8x8xf32> to vector<8xf32>
    %226 = vector.shape_cast %225 : vector<8xf32> to vector<8x1xf32>
    %227 = vector.broadcast %226 : vector<8x1xf32> to vector<8x8xf32>
    %228 = arith.subf %224, %227 : vector<8x8xf32>
    %229 = math.exp %228 : vector<8x8xf32>
    %cst_102 = arith.constant dense<0.000000e+00> : vector<8xf32>
    %230 = vector.multi_reduction <add>, %229, %cst_102 [1] : vector<8x8xf32> to vector<8xf32>
    %231 = vector.shape_cast %230 : vector<8xf32> to vector<8x1xf32>
    %232 = tpu.reciprocal %231 {approx = true} : vector<8x1xf32> -> vector<8x1xf32>
    %233 = vector.broadcast %232 : vector<8x1xf32> to vector<8x8xf32>
    %234 = arith.mulf %229, %233 : vector<8x8xf32>
    %cst_103 = arith.constant dense<0.000000e+00> : vector<8x8xf32>
    %235 = tpu.matmul %234, %221, %cst_103 {dimension_numbers = #tpu.dot_dimension_numbers<[1], [0], [0], [1], [0, 0, 1, 1], [], []>} : vector<8x8xf32>, vector<8x8xf32>, vector<8x8xf32> -> vector<8x8xf32>
    %236 = tpu.concatenate %184, %201, %218, %235 in 1 : vector<8x8xf32>, vector<8x8xf32>, vector<8x8xf32>, vector<8x8xf32> -> vector<8x32xf32>
    %c1_104 = arith.constant 1 : index
    %c0_105 = arith.constant 0 : index
    %c0_106 = arith.constant 0 : index
    %237 = vector.load %arg7[%c1_104, %c0_105, %c0_106] : memref<2x32x32xf32, #tpu.memory_space<vmem>>, vector<1x32x32xf32>
    %238 = vector.shape_cast %237 : vector<1x32x32xf32> to vector<32x32xf32>
    %cst_107 = arith.constant dense<0.000000e+00> : vector<8x32xf32>
    %239 = tpu.matmul %236, %238, %cst_107 {dimension_numbers = #tpu.dot_dimension_numbers<[1], [0], [0], [1], [0, 0, 1, 1], [], []>} : vector<8x32xf32>, vector<32x32xf32>, vector<8x32xf32> -> vector<8x32xf32>
    %c1_108 = arith.constant 1 : index
    %c0_109 = arith.constant 0 : index
    %c0_110 = arith.constant 0 : index
    %240 = vector.load %arg8[%c1_108, %c0_109, %c0_110] : memref<2x1x32xf32, #tpu.memory_space<vmem>>, vector<1x1x32xf32>
    %241 = vector.shape_cast %240 : vector<1x1x32xf32> to vector<1x32xf32>
    %242 = vector.broadcast %241 : vector<1x32xf32> to vector<8x32xf32>
    %243 = arith.addf %239, %242 : vector<8x32xf32>
    %244 = arith.addf %160, %243 : vector<8x32xf32>
    %cst_111 = arith.constant dense<0.000000e+00> : vector<8xf32>
    %245 = vector.multi_reduction <add>, %244, %cst_111 [1] : vector<8x32xf32> to vector<8xf32>
    %246 = vector.shape_cast %245 : vector<8xf32> to vector<8x1xf32>
    %cst_112 = arith.constant 3.200000e+01 : f32
    %247 = vector.broadcast %cst_112 : f32 to vector<8x1xf32>
    %248 = arith.divf %246, %247 : vector<8x1xf32>
    %249 = vector.broadcast %248 : vector<8x1xf32> to vector<8x32xf32>
    %250 = arith.subf %244, %249 : vector<8x32xf32>
    %251 = arith.mulf %250, %250 : vector<8x32xf32>
    %cst_113 = arith.constant dense<0.000000e+00> : vector<8xf32>
    %252 = vector.multi_reduction <add>, %251, %cst_113 [1] : vector<8x32xf32> to vector<8xf32>
    %253 = vector.shape_cast %252 : vector<8xf32> to vector<8x1xf32>
    %cst_114 = arith.constant 3.200000e+01 : f32
    %254 = vector.broadcast %cst_114 : f32 to vector<8x1xf32>
    %255 = arith.divf %253, %254 : vector<8x1xf32>
    %256 = vector.broadcast %248 : vector<8x1xf32> to vector<8x32xf32>
    %257 = arith.subf %244, %256 : vector<8x32xf32>
    %cst_115 = arith.constant 9.99999974E-6 : f32
    %258 = vector.broadcast %cst_115 : f32 to vector<8x1xf32>
    %259 = arith.addf %255, %258 : vector<8x1xf32>
    %260 = math.rsqrt %259 : vector<8x1xf32>
    %261 = vector.broadcast %260 : vector<8x1xf32> to vector<8x32xf32>
    %262 = arith.mulf %257, %261 : vector<8x32xf32>
    %c1_116 = arith.constant 1 : index
    %c0_117 = arith.constant 0 : index
    %c0_118 = arith.constant 0 : index
    %263 = vector.load %arg9[%c1_116, %c0_117, %c0_118] : memref<2x1x32xf32, #tpu.memory_space<vmem>>, vector<1x1x32xf32>
    %264 = vector.shape_cast %263 : vector<1x1x32xf32> to vector<1x32xf32>
    %265 = vector.broadcast %264 : vector<1x32xf32> to vector<8x32xf32>
    %266 = arith.mulf %262, %265 : vector<8x32xf32>
    %c1_119 = arith.constant 1 : index
    %c0_120 = arith.constant 0 : index
    %c0_121 = arith.constant 0 : index
    %267 = vector.load %arg10[%c1_119, %c0_120, %c0_121] : memref<2x1x32xf32, #tpu.memory_space<vmem>>, vector<1x1x32xf32>
    %268 = vector.shape_cast %267 : vector<1x1x32xf32> to vector<1x32xf32>
    %269 = vector.broadcast %268 : vector<1x32xf32> to vector<8x32xf32>
    %270 = arith.addf %266, %269 : vector<8x32xf32>
    %c1_122 = arith.constant 1 : index
    %c0_123 = arith.constant 0 : index
    %c0_124 = arith.constant 0 : index
    %271 = vector.load %arg11[%c1_122, %c0_123, %c0_124] : memref<2x32x64xf32, #tpu.memory_space<vmem>>, vector<1x32x64xf32>
    %272 = vector.shape_cast %271 : vector<1x32x64xf32> to vector<32x64xf32>
    %cst_125 = arith.constant dense<0.000000e+00> : vector<8x64xf32>
    %273 = tpu.matmul %270, %272, %cst_125 {dimension_numbers = #tpu.dot_dimension_numbers<[1], [0], [0], [1], [0, 0, 1, 1], [], []>} : vector<8x32xf32>, vector<32x64xf32>, vector<8x64xf32> -> vector<8x64xf32>
    %c1_126 = arith.constant 1 : index
    %c0_127 = arith.constant 0 : index
    %c0_128 = arith.constant 0 : index
    %274 = vector.load %arg12[%c1_126, %c0_127, %c0_128] : memref<2x1x64xf32, #tpu.memory_space<vmem>>, vector<1x1x64xf32>
    %275 = vector.shape_cast %274 : vector<1x1x64xf32> to vector<1x64xf32>
    %276 = vector.broadcast %275 : vector<1x64xf32> to vector<8x64xf32>
    %277 = arith.addf %273, %276 : vector<8x64xf32>
    %cst_129 = arith.constant 0.000000e+00 : f32
    %278 = vector.broadcast %cst_129 : f32 to vector<8x64xf32>
    %279 = arith.maximumf %277, %278 : vector<8x64xf32>
    %c1_130 = arith.constant 1 : index
    %c0_131 = arith.constant 0 : index
    %c0_132 = arith.constant 0 : index
    %280 = vector.load %arg13[%c1_130, %c0_131, %c0_132] : memref<2x64x32xf32, #tpu.memory_space<vmem>>, vector<1x64x32xf32>
    %281 = vector.shape_cast %280 : vector<1x64x32xf32> to vector<64x32xf32>
    %cst_133 = arith.constant dense<0.000000e+00> : vector<8x32xf32>
    %282 = tpu.matmul %279, %281, %cst_133 {dimension_numbers = #tpu.dot_dimension_numbers<[1], [0], [0], [1], [0, 0, 1, 1], [], []>} : vector<8x64xf32>, vector<64x32xf32>, vector<8x32xf32> -> vector<8x32xf32>
    %c1_134 = arith.constant 1 : index
    %c0_135 = arith.constant 0 : index
    %c0_136 = arith.constant 0 : index
    %283 = vector.load %arg14[%c1_134, %c0_135, %c0_136] : memref<2x1x32xf32, #tpu.memory_space<vmem>>, vector<1x1x32xf32>
    %284 = vector.shape_cast %283 : vector<1x1x32xf32> to vector<1x32xf32>
    %285 = vector.broadcast %284 : vector<1x32xf32> to vector<8x32xf32>
    %286 = arith.addf %282, %285 : vector<8x32xf32>
    %287 = arith.addf %270, %286 : vector<8x32xf32>
    %cst_137 = arith.constant dense<0.000000e+00> : vector<8xf32>
    %288 = vector.multi_reduction <add>, %287, %cst_137 [1] : vector<8x32xf32> to vector<8xf32>
    %289 = vector.shape_cast %288 : vector<8xf32> to vector<8x1xf32>
    %cst_138 = arith.constant 3.200000e+01 : f32
    %290 = vector.broadcast %cst_138 : f32 to vector<8x1xf32>
    %291 = arith.divf %289, %290 : vector<8x1xf32>
    %292 = vector.broadcast %291 : vector<8x1xf32> to vector<8x32xf32>
    %293 = arith.subf %287, %292 : vector<8x32xf32>
    %294 = arith.mulf %293, %293 : vector<8x32xf32>
    %cst_139 = arith.constant dense<0.000000e+00> : vector<8xf32>
    %295 = vector.multi_reduction <add>, %294, %cst_139 [1] : vector<8x32xf32> to vector<8xf32>
    %296 = vector.shape_cast %295 : vector<8xf32> to vector<8x1xf32>
    %cst_140 = arith.constant 3.200000e+01 : f32
    %297 = vector.broadcast %cst_140 : f32 to vector<8x1xf32>
    %298 = arith.divf %296, %297 : vector<8x1xf32>
    %299 = vector.broadcast %291 : vector<8x1xf32> to vector<8x32xf32>
    %300 = arith.subf %287, %299 : vector<8x32xf32>
    %cst_141 = arith.constant 9.99999974E-6 : f32
    %301 = vector.broadcast %cst_141 : f32 to vector<8x1xf32>
    %302 = arith.addf %298, %301 : vector<8x1xf32>
    %303 = math.rsqrt %302 : vector<8x1xf32>
    %304 = vector.broadcast %303 : vector<8x1xf32> to vector<8x32xf32>
    %305 = arith.mulf %300, %304 : vector<8x32xf32>
    %c1_142 = arith.constant 1 : index
    %c0_143 = arith.constant 0 : index
    %c0_144 = arith.constant 0 : index
    %306 = vector.load %arg15[%c1_142, %c0_143, %c0_144] : memref<2x1x32xf32, #tpu.memory_space<vmem>>, vector<1x1x32xf32>
    %307 = vector.shape_cast %306 : vector<1x1x32xf32> to vector<1x32xf32>
    %308 = vector.broadcast %307 : vector<1x32xf32> to vector<8x32xf32>
    %309 = arith.mulf %305, %308 : vector<8x32xf32>
    %c1_145 = arith.constant 1 : index
    %c0_146 = arith.constant 0 : index
    %c0_147 = arith.constant 0 : index
    %310 = vector.load %arg16[%c1_145, %c0_146, %c0_147] : memref<2x1x32xf32, #tpu.memory_space<vmem>>, vector<1x1x32xf32>
    %311 = vector.shape_cast %310 : vector<1x1x32xf32> to vector<1x32xf32>
    %312 = vector.broadcast %311 : vector<1x32xf32> to vector<8x32xf32>
    %313 = arith.addf %309, %312 : vector<8x32xf32>
    %c0_148 = arith.constant 0 : index
    %c0_149 = arith.constant 0 : index
    %314 = vector.load %arg17[%c0_148, %c0_149] : memref<32x128xf32, #tpu.memory_space<vmem>>, vector<32x128xf32>
    %cst_150 = arith.constant dense<0.000000e+00> : vector<8x128xf32>
    %315 = tpu.matmul %313, %314, %cst_150 {dimension_numbers = #tpu.dot_dimension_numbers<[1], [0], [0], [1], [0, 0, 1, 1], [], []>} : vector<8x32xf32>, vector<32x128xf32>, vector<8x128xf32> -> vector<8x128xf32>
    %c0_151 = arith.constant 0 : index
    %c0_152 = arith.constant 0 : index
    %316 = vector.load %arg18[%c0_151, %c0_152] : memref<1x128xf32, #tpu.memory_space<vmem>>, vector<1x128xf32>
    %317 = vector.broadcast %316 : vector<1x128xf32> to vector<8x128xf32>
    %318 = arith.addf %315, %317 : vector<8x128xf32>
    %319 = arith.negf %318 : vector<8x128xf32>
    %320 = math.exp %319 : vector<8x128xf32>
    %cst_153 = arith.constant 1.000000e+00 : f32
    %321 = vector.broadcast %cst_153 : f32 to vector<8x128xf32>
    %322 = arith.addf %321, %320 : vector<8x128xf32>
    %323 = arith.divf %321, %322 : vector<8x128xf32>
    %c0_154 = arith.constant 0 : index
    %c0_155 = arith.constant 0 : index
    %324 = vector.load %arg19[%c0_154, %c0_155] : memref<8x128xf32, #tpu.memory_space<vmem>>, vector<8x128xf32>
    tpu.vector_store %arg19[%c0_154, %c0_155], %323 {strides = array<i32>} : memref<8x128xf32, #tpu.memory_space<vmem>>, vector<8x128xf32>,
    return
  }
  func.func @transform_0(%arg0: i32) -> (i32, i32) {
    %c0_i32 = arith.constant 0 : i32
    %c0_i32_0 = arith.constant 0 : i32
    return %arg0, %c0_i32 : i32, i32
  }
  func.func @transform_1(%arg0: i32) -> (i32, i32) {
    %c0_i32 = arith.constant 0 : i32
    %c0_i32_0 = arith.constant 0 : i32
    %c0_i32_1 = arith.constant 0 : i32
    return %c0_i32, %c0_i32_0 : i32, i32
  }
  func.func @transform_2(%arg0: i32) -> (i32, i32) {
    %c0_i32 = arith.constant 0 : i32
    %c0_i32_0 = arith.constant 0 : i32
    %c0_i32_1 = arith.constant 0 : i32
    return %c0_i32, %c0_i32_0 : i32, i32
  }
  func.func @transform_3(%arg0: i32) -> (i32, i32) {
    %c0_i32 = arith.constant 0 : i32
    %c0_i32_0 = arith.constant 0 : i32
    %c0_i32_1 = arith.constant 0 : i32
    return %c0_i32, %c0_i32_0 : i32, i32
  }
  func.func @transform_4(%arg0: i32) -> (i32, i32, i32) {
    %c0_i32 = arith.constant 0 : i32
    %c0_i32_0 = arith.constant 0 : i32
    %c0_i32_1 = arith.constant 0 : i32
    %c0_i32_2 = arith.constant 0 : i32
    return %c0_i32, %c0_i32_0, %c0_i32_1 : i32, i32, i32
  }
  func.func @transform_5(%arg0: i32) -> (i32, i32, i32) {
    %c0_i32 = arith.constant 0 : i32
    %c0_i32_0 = arith.constant 0 : i32
    %c0_i32_1 = arith.constant 0 : i32
    %c0_i32_2 = arith.constant 0 : i32
    return %c0_i32, %c0_i32_0, %c0_i32_1 : i32, i32, i32
  }
  func.func @transform_6(%arg0: i32) -> (i32, i32, i32) {
    %c0_i32 = arith.constant 0 : i32
    %c0_i32_0 = arith.constant 0 : i32
    %c0_i32_1 = arith.constant 0 : i32
    %c0_i32_2 = arith.constant 0 : i32
    return %c0_i32, %c0_i32_0, %c0_i32_1 : i32, i32, i32
  }
  func.func @transform_7(%arg0: i32) -> (i32, i32, i32) {
    %c0_i32 = arith.constant 0 : i32
    %c0_i32_0 = arith.constant 0 : i32
    %c0_i32_1 = arith.constant 0 : i32
    %c0_i32_2 = arith.constant 0 : i32
    return %c0_i32, %c0_i32_0, %c0_i32_1 : i32, i32, i32
  }
  func.func @transform_8(%arg0: i32) -> (i32, i32, i32) {
    %c0_i32 = arith.constant 0 : i32
    %c0_i32_0 = arith.constant 0 : i32
    %c0_i32_1 = arith.constant 0 : i32
    %c0_i32_2 = arith.constant 0 : i32
    return %c0_i32, %c0_i32_0, %c0_i32_1 : i32, i32, i32
  }
  func.func @transform_9(%arg0: i32) -> (i32, i32, i32) {
    %c0_i32 = arith.constant 0 : i32
    %c0_i32_0 = arith.constant 0 : i32
    %c0_i32_1 = arith.constant 0 : i32
    %c0_i32_2 = arith.constant 0 : i32
    return %c0_i32, %c0_i32_0, %c0_i32_1 : i32, i32, i32
  }
  func.func @transform_10(%arg0: i32) -> (i32, i32, i32) {
    %c0_i32 = arith.constant 0 : i32
    %c0_i32_0 = arith.constant 0 : i32
    %c0_i32_1 = arith.constant 0 : i32
    %c0_i32_2 = arith.constant 0 : i32
    return %c0_i32, %c0_i32_0, %c0_i32_1 : i32, i32, i32
  }
  func.func @transform_11(%arg0: i32) -> (i32, i32, i32) {
    %c0_i32 = arith.constant 0 : i32
    %c0_i32_0 = arith.constant 0 : i32
    %c0_i32_1 = arith.constant 0 : i32
    %c0_i32_2 = arith.constant 0 : i32
    return %c0_i32, %c0_i32_0, %c0_i32_1 : i32, i32, i32
  }
  func.func @transform_12(%arg0: i32) -> (i32, i32, i32) {
    %c0_i32 = arith.constant 0 : i32
    %c0_i32_0 = arith.constant 0 : i32
    %c0_i32_1 = arith.constant 0 : i32
    %c0_i32_2 = arith.constant 0 : i32
    return %c0_i32, %c0_i32_0, %c0_i32_1 : i32, i32, i32
  }
  func.func @transform_13(%arg0: i32) -> (i32, i32, i32) {
    %c0_i32 = arith.constant 0 : i32
    %c0_i32_0 = arith.constant 0 : i32
    %c0_i32_1 = arith.constant 0 : i32
    %c0_i32_2 = arith.constant 0 : i32
    return %c0_i32, %c0_i32_0, %c0_i32_1 : i32, i32, i32
  }
  func.func @transform_14(%arg0: i32) -> (i32, i32, i32) {
    %c0_i32 = arith.constant 0 : i32
    %c0_i32_0 = arith.constant 0 : i32
    %c0_i32_1 = arith.constant 0 : i32
    %c0_i32_2 = arith.constant 0 : i32
    return %c0_i32, %c0_i32_0, %c0_i32_1 : i32, i32, i32
  }
  func.func @transform_15(%arg0: i32) -> (i32, i32, i32) {
    %c0_i32 = arith.constant 0 : i32
    %c0_i32_0 = arith.constant 0 : i32
    %c0_i32_1 = arith.constant 0 : i32
    %c0_i32_2 = arith.constant 0 : i32
    return %c0_i32, %c0_i32_0, %c0_i32_1 : i32, i32, i32
  }
  func.func @transform_16(%arg0: i32) -> (i32, i32) {
    %c0_i32 = arith.constant 0 : i32
    %c0_i32_0 = arith.constant 0 : i32
    %c0_i32_1 = arith.constant 0 : i32
    return %c0_i32, %c0_i32_0 : i32, i32
  }
  func.func @transform_17(%arg0: i32) -> (i32, i32) {
    %c0_i32 = arith.constant 0 : i32
    %c0_i32_0 = arith.constant 0 : i32
    %c0_i32_1 = arith.constant 0 : i32
    return %c0_i32, %c0_i32_0 : i32, i32
  }
  func.func @transform_18(%arg0: i32) -> (i32, i32) {
    %c0_i32 = arith.constant 0 : i32
    %c0_i32_0 = arith.constant 0 : i32
    return %arg0, %c0_i32 : i32, i32
  }
}

</mosaic_0001>

<bundles_post_ra>
// kernel: vit_forward.1
= control target key start
LH: loop header
LB: loop body
LE: loop exit
PB: predicated region body
PF: predicated region fallthrough
CT: control target
= control target key end

     0   :  { %s3647_s27 = smov 0   ;;  %s4109_s0 = inlined_call_operand.vmem [shape: f32[16,64], index: 0, kind: input, shape index: {}]   ;;  %s4110_s1 = inlined_call_operand.vmem [shape: f32[64,32], index: 1, kind: input, shape index: {}]   ;;  %s4111_s2 = inlined_call_operand.vmem [shape: f32[1,32], index: 2, kind: input, shape index: {}]   ;;  %s4112_s3 = inlined_call_operand.vmem [shape: f32[8,32], index: 3, kind: input, shape index: {}]   ;;  %s4113_s4 = inlined_call_operand.vmem [shape: f32[2,32,96], index: 4, kind: input, shape index: {}]   ;;  %s4114_s5 = inlined_call_operand.vmem [shape: f32[2,1,96], index: 5, kind: input, shape index: {}]   ;;  %s4115_s6 = inlined_call_operand.vmem [shape: f32[2,32,32], index: 6, kind: input, shape index: {}]   ;;  %s4116_s7 = inlined_call_operand.vmem [shape: f32[2,1,32], index: 7, kind: input, shape index: {}]   ;;  %s4117_s8 = inlined_call_operand.vmem [shape: f32[2,1,32], index: 8, kind: input, shape index: {}]   ;;  %s4118_s9 = inlined_call_operand.vmem [shape: f32[2,1,32], index: 9, kind: input, shape index: {}]   ;;  %s4119_s10 = inlined_call_operand.vmem [shape: f32[2,32,64], index: 10, kind: input, shape index: {}]   ;;  %s4120_s11 = inlined_call_operand.vmem [shape: f32[2,1,64], index: 11, kind: input, shape index: {}]   ;;  %s4121_s12 = inlined_call_operand.vmem [shape: f32[2,64,32], index: 12, kind: input, shape index: {}]   ;;  %s4122_s13 = inlined_call_operand.vmem [shape: f32[2,1,32], index: 13, kind: input, shape index: {}]   ;;  %s4123_s14 = inlined_call_operand.vmem [shape: f32[2,1,32], index: 14, kind: input, shape index: {}]   ;;  %s4124_s15 = inlined_call_operand.vmem [shape: f32[2,1,32], index: 15, kind: input, shape index: {}]   ;;  %s4125_s16 = inlined_call_operand.vmem [shape: f32[32,128], index: 16, kind: input, shape index: {}]   ;;  %s4126_s17 = inlined_call_operand.vmem [shape: f32[1,128], index: 17, kind: input, shape index: {}]   ;;  %s4127_s18 = inlined_call_operand.vmem [shape: f32[16,128], index: 18, kind: output, shape index: {}]  }
   0x1   :  { %4141 = sst [smem:[#allocation2_spill]] %s4109_s0 }
   0x2   :  { %4142 = sst [smem:[#allocation3_spill]] %s4110_s1 }
   0x3   :  { %4143 = sst [smem:[#allocation4_spill]] %s4111_s2 }
   0x4 LB: > { %s2982_s28 = sadd.s32 4294967295, %s3533_s27   ;;  %p2986_p0 = scmp.ge.s32.totalorder %s3533_s27, 1  ;;  %s3533_s27 = sphi %s3647_s27, %s28_s27  }
   0x5   : > { %p511_p1 = scmp.lt.s32.totalorder %s3533_s27, 3 }
   0x7   : > { %p512_p2 = pnand %p2986_p0, %p511_p1 }
   0x8   : > { %s4144_s0 = sld [smem:[#allocation3_spill]] (!%p512_p2)  ;;  %v3535_v3 = vmov (!%p512_p2), 0.0|0.0   ;;  %vm3536_vm0 = vmmov (!%p512_p2), 0   ;;  %v3537_v6 = vmov (!%p512_p2), 0.0   ;;  %p563_p3 = scmp.lt.s32.totalorder (!%p512_p2), %s2982_s28, 1  ;;  %v663_v7 = vld [vmem:[%s4113_s4] sm:$0xff] (!%p512_p2) }
   0x9   : > { %515 = sbr.rel (%p512_p2) target bundleno = 6048 (0x17a0), region = 92  ;;  %3380 = vmatprep.subr.bf16.mxu0 (!%p512_p2), %v3535_v3  ;;  %3182 = vmatprep.mubr.msk.f32.mxu0 (!%p512_p2), %vm3536_vm0, %v3537_v6  ;;  %v664_v9 = vld [vmem:[%s4113_s4 + $0x8] sm:$0xff] (!%p512_p2)  ;;  %s4145_s26 = sld [smem:[#allocation2_spill]] (!%p512_p2)  ;;  %vm589_vm1 = vcmask (!%p512_p2), 523264   ;;  %v665_v18 = vld [vmem:[%s4113_s4 + $0x10] sm:$0xff] (!%p512_p2)  ;;  %v666_v19 = vld [vmem:[%s4113_s4 + $0x18] sm:$0xff] (!%p512_p2) }
   0xa   : > { %3392 = vmatprep.subr.bf16.mxu1 (!%p512_p2), %v3535_v3  ;;  %3193 = vmatprep.mubr.msk.f32.mxu1 (!%p512_p2), %vm3536_vm0, %v3537_v6  ;;  %v3393_v12 = vpack.c.bf16 (!%p512_p2), %v664_v9, %v663_v7  ;;  %v3396_v20 = vpack.c.bf16 (!%p512_p2), %v666_v19, %v665_v18  ;;  %s4146_s2 = sld [smem:[#allocation4_spill]] (!%p512_p2)  ;;  %v581_v22 = vld [vmem:[%s4112_s3] sm:$0xff] (!%p512_p2)  ;;  %vm674_vm2 = vcmask (!%p512_p2), 261120   ;;  %s4132_s30 = smov (!%p512_p2), 64   ;;  %vm751_vm3 = vcmask (!%p512_p2), 64512  }
   0xb   : > { %v2991_v27 = vld [vmem:[%s4114_s5] ss:$0 sm:$0xff] (!%p512_p2)  ;;  %s3539_s19 = smov (!%p512_p2), 96   ;;  %s3540_s1 = smov (!%p512_p2), 88   ;;  %vm1425_vm4 = vcmask (!%p512_p2), 130048   ;;  %vm1427_vm5 = vcmask (!%p512_p2), 195584  }
   0xc   : > { %3394 = vmatpush3.bf16.msra.mxu1 (!%p512_p2), %v3393_v12  ;;  %s4140_s20 = smov (!%p512_p2), 120   ;;  %s4135_s21 = smov (!%p512_p2), 80  }
   0xd   : > { %3395 = vmatprep.subr.bf16.mxu1 (!%p512_p2), %v3535_v3  ;;  %s4134_s22 = smov (!%p512_p2), 72   ;;  %s4136_s24 = smov (!%p512_p2), 104  }
   0xe   : > { %v572_v0 = vld [vmem:[%s4144_s0] sm:$0xff] (!%p512_p2)  ;;  %v573_v1 = vld [vmem:[%s4144_s0 + $0x8] sm:$0xff] (!%p512_p2)  ;;  %v574_v2 = vld [vmem:[%s4144_s0 + $0x10] sm:$0xff] (!%p512_p2)  ;;  %s4133_s25 = smov (!%p512_p2), 56  }
   0xf   : > { %v3381_v4 = vpack.c.bf16 (!%p512_p2), %v573_v1, %v572_v0  ;;  %v575_v5 = vld [vmem:[%s4144_s0 + $0x18] sm:$0xff] (!%p512_p2)  ;;  %v576_v10 = vld [vmem:[%s4144_s0 + $0x20] sm:$0xff] (!%p512_p2)  ;;  %v577_v11 = vld [vmem:[%s4144_s0 + $0x28] sm:$0xff] (!%p512_p2) }
  0x10   : > { %v3384_v8 = vpack.c.bf16 %v575_v5, %v574_v2  ;;  %s4160_s28 = smov (!%p563_p3, %s2982_s28), 1  ;;  %v3387_v13 = vpack.c.bf16 %v577_v11, %v576_v10  ;;  %v578_v14 = vld [vmem:[%s4144_s0 + $0x30] sm:$0xff]  ;;  %v579_v15 = vld [vmem:[%s4144_s0 + $0x38] sm:$0xff]  ;;  %3397 = vmatpush3.bf16.msra.mxu1 %v3396_v20  ;;  %v2989_v21 = vld [vmem:[%s4146_s2] ss:$0 sm:$0xff]  ;;  %s3544_s2 = smov 112  }
  0x11   : > { %3382 = vmatpush3.bf16.msra.mxu0 %v3381_v4  ;;  %s4129_s23 = sshll.u32 %s4160_s28, 3  ;;  %v3390_v16 = vpack.c.bf16 %v579_v15, %v578_v14  ;;  %3196 = vmatprep.subr.mxu1 %v3537_v6  ;;  %v588_v23 = vadd.f32 %v2989_v21, %v581_v22 }
  0x12   : > { %3383 = vmatprep.subr.bf16.mxu0 %v3535_v3  ;;  %s566_s29 = scalar_lea.vmem %s4145_s26, %s4129_s23  ;;  %s4131_s26 = smov 48  }
  0x13   : > { %v571_v17 = vld [vmem:[%s566_s29] sm:$0xff]  ;;  %s4130_s29 = smov 40   ;;  %s4139_s23 = smov 8  }
  0x15   : > { %3385 = vmatpush3.bf16.msra.mxu0 %v3384_v8 }
  0x16   : > { %3386 = vmatprep.subr.bf16.mxu0 %v3535_v3 }
  0x19   : > { %3388 = vmatpush3.bf16.msra.mxu0 %v3387_v13 }
  0x1a   : > { %3389 = vmatprep.subr.bf16.mxu0 %v3535_v3 }
  0x1d   : > { %3391 = vmatpush3.bf16.msra.mxu0 %v3390_v16 }
  0x1e   : > { %3216 = vmatprep.subr.mxu0 %v3537_v6 }
  0x20   : > { %3183 = vmatmul.mubr.msk.f32.vlgmr.msra.gmra.mrb[0].mxu0 %vm589_vm1, %v571_v17 }
  0x21   : > { %3218 = vmatprep.mubr.msk.f32.mxu0 %vm3536_vm0, %v3537_v6 }
  0xf3   : > { %v659_v24 = vpop.f32.mrb[0].mxu0 }
  0xf4   : > { %v3720_v25 = vadd.f32 %v659_v24, %v588_v23  ;;  %v3184_v26 = vpop.f32.mrb[1].mxu0 }
  0xf6   : > { %3194 = vmatmul.mubr.msk.f32.vlgmr.msra.gmra.mrb[0].mxu1 %vm674_vm2, %v3720_v25 }
  0xf7   : > { %3198 = vmatprep.mubr.msk.f32.mxu1 %vm3536_vm0, %v3537_v6 }
 0x1c9   : > { %v744_v28 = vpop.f32.mrb[0].mxu1 }
 0x1ca   : > { %v3729_v29 = vadd.f32 %v2991_v27, %v744_v28  ;;  %v3195_v30 = vpop.f32.mrb[1].mxu1 }
 0x1cc   : > { %838 = vrot.lane.b32.xlu1 %v3729_v29, %s4132_s30  ;;  %749 = vrot.lane.b32.xlu0 %v3729_v29, %s3539_s19  ;;  %s4138_s30 = smov 16  }
 0x1d0   : > { %916 = vrot.lane.b32.xlu1 %v3729_v29, %s3540_s1 }
 0x1d4   : > { %914 = vrot.lane.b32.xlu1 %v3729_v29, %s4140_s20  ;;  %s4150_s20 = smov 72  }
 0x1d8   : > { %1082 = vrot.lane.b32.xlu1 %v3729_v29, %s4135_s21  ;;  %s4148_s21 = smov 104  }
 0x23e   : > { %v839_v31 = vpop.permute.xlu1 %838  ;;  %v750_v32 = vpop.permute.xlu0 %749 }
 0x23f   : > { %3197 = vmatpush3.xpose.msk.msra.mxu1 %vm751_vm3, %v750_v32  ;;  %v1430_v32 = vld [vmem:[%s4115_s6 + $0x8] sm:$0xff] }
 0x240   : > { %3201 = vmatprep.subr.mxu1 %v3537_v6 }
 0x242   : > { %v917_v33 = vpop.permute.xlu1 %916  ;;  %3199 = vmatmul.mubr.msk.f32.vlgmr.msra.gmra.mrb[2].mxu1 %vm751_vm3, %v3729_v29 }
 0x243   : > { %3202 = vmatpush3.msra.mxu1 %v839_v31  ;;  %3203 = vmatprep.mubr.msk.f32.mxu1 %vm3536_vm0, %v3537_v6  ;;  %v1429_v31 = vld [vmem:[%s4115_s6] sm:$0xff] }
 0x244   : > { %3206 = vmatprep.subr.mxu1 %v3537_v6 }
 0x246   : > { %v915_v34 = vpop.permute.xlu1 %914 }
 0x24a   : > { %v1083_v35 = vpop.permute.xlu1 %1082 }
 0x24b   : > { %3217 = vmatpush3.xpose.msk.msra.mxu0 %vm751_vm3, %v1083_v35  ;;  %v1432_v35 = vld [vmem:[%s4115_s6 + $0x18] sm:$0xff] }
 0x24c   : > { %3226 = vmatprep.subr.mxu0 %v3537_v6 }
 0x315   : > { %v822_v36 = vpop.f32.mrb[2].mxu1 }
 0x316   : > { %v826_v37 = vmul.f32 0.35355338, %v822_v36  ;;  %v3200_v38 = vpop.f32.mrb[3].mxu1 }
 0x318   : > { %v827_v39 = vsel %vm751_vm3, %v826_v37, -inf }
 0x319   : > { %828 = vmax.xlane.f32.xlu0 %v827_v39 }
 0x32f   : > { %1248 = vrot.lane.b32.xlu0 %v3729_v29, %s4134_s22  ;;  %s4137_s22 = smov 24  }
 0x3a6   : > { %v829_v40 = vpop.xlane.xlu0 %828 }
 0x3a7   : > { %v830_v41 = vsub.f32 %v826_v37, %v829_v40 }
 0x3a9   : > { %v831_v42 = vmul.f32 1.442695, %v830_v41 }
 0x3aa   : > { %v1249_v47 = vpop.permute.xlu0 %1248 }
 0x3ab   : > { %3483 = vpow2.f32 %v831_v42 }
 0x3b5   : > { %v3484_v43 = vpop.eup %3483 }
 0x3b6   : > { %v833_v44 = vsel %vm751_vm3, %v3484_v43, 0.0 }
 0x3b7   : > { %834 = vadd.xlane.f32.xlu1 %v833_v44 }
 0x3c8   : > { %1080 = vrot.lane.b32.xlu1 %v3729_v29, %s3544_s2 }
 0x3cc   : > { %1246 = vrot.lane.b32.xlu1 %v3729_v29, %s4136_s24  ;;  %s4154_s24 = smov 40  }
 0x444   : > { %v835_v45 = vpop.xlane.xlu1 %834 }
 0x445   : > { %3485 = vrcp.f32 %v835_v45 }
 0x448   : > { %v1081_v46 = vpop.permute.xlu1 %1080 }
 0x449   : > { %3219 = vmatmul.mubr.msk.f32.vlgmr.msra.gmra.mrb[2].mxu0 %vm751_vm3, %v1081_v46 }
 0x44a   : > { %3227 = vmatpush3.xpose.msk.msra.mxu0 %vm751_vm3, %v1249_v47  ;;  %3228 = vmatprep.mubr.msk.f32.mxu0 %vm3536_vm0, %v3537_v6 }
 0x44b   : > { %3398 = vmatprep.subr.bf16.mxu0 %v3535_v3 }
 0x44c   : > { %v1247_v48 = vpop.permute.xlu1 %1246 }
 0x44d   : > { %3229 = vmatmul.mubr.msk.f32.vlgmr.msra.gmra.mrb[4].mxu0 %vm751_vm3, %v1247_v48 }
 0x44e   : > { %3244 = vmatprep.mubr.msk.f32.mxu0 %vm3536_vm0, %v3537_v6 }
 0x44f   : > { %v3486_v49 = vpop.eup %3485 }
 0x450   : > { %v837_v50 = vmul.f32 %v3486_v49, %v3484_v43  ;;  %v3005_v49 = vld [vmem:[%s4116_s7] ss:$0 sm:$0xff] }
 0x452   : > { %3204 = vmatmul.mubr.msk.f32.vlgmr.msra.gmra.mrb[4].mxu1 %vm751_vm3, %v837_v50 }
 0x453   : > { %3207 = vmatpush3.xpose.msk.msra.mxu1 %vm751_vm3, %v917_v33  ;;  %3208 = vmatprep.mubr.msk.f32.mxu1 %vm3536_vm0, %v3537_v6  ;;  %v3399_v33 = vpack.c.bf16 %v1430_v32, %v1429_v31 }
 0x454   : > { %3211 = vmatprep.subr.mxu1 %v3537_v6 }
 0x455   : > { %3400 = vmatpush3.bf16.msra.mxu0 %v3399_v33 }
 0x456   : > { %3209 = vmatmul.mubr.msk.f32.vlgmr.msra.gmra.mrb[6].mxu1 %vm751_vm3, %v915_v34  ;;  %3401 = vmatprep.subr.bf16.mxu0 %v3535_v3  ;;  %v1431_v34 = vld [vmem:[%s4115_s6 + $0x10] sm:$0xff] }
 0x457   : > { %3213 = vmatprep.mubr.msk.f32.mxu1 %vm3536_vm0, %v3537_v6  ;;  %v3402_v36 = vpack.c.bf16 %v1432_v35, %v1431_v34 }
 0x459   : > { %3403 = vmatpush3.bf16.msra.mxu0 %v3402_v36 }
 0x45a   : > { %3410 = vmatprep.subr.bf16.mxu0 %v3535_v3 }
 0x51c   : > { %v1154_v51 = vpop.f32.mrb[2].mxu0 }
 0x51d   : > { %v1158_v52 = vmul.f32 0.35355338, %v1154_v51  ;;  %v3220_v53 = vpop.f32.mrb[3].mxu0 }
 0x51f   : > { %v1159_v54 = vsel %vm751_vm3, %v1158_v52, -inf }
 0x520   : > { %1160 = vmax.xlane.f32.xlu0 %v1159_v54  ;;  %v1320_v55 = vpop.f32.mrb[4].mxu0 }
 0x521   : > { %v3230_v56 = vpop.f32.mrb[5].mxu0  ;;  %v1324_v62 = vmul.f32 0.35355338, %v1320_v55 }
 0x523   : > { %v1325_v0 = vsel %vm751_vm3, %v1324_v62, -inf }
 0x525   : > { %v3775_v57 = vpop.f32.mrb[4].mxu1 }
 0x526   : > { %v3205_v58 = vpop.f32.mrb[5].mxu1 }
 0x529   : > { %v988_v59 = vpop.f32.mrb[6].mxu1 }
 0x52a   : > { %v992_v60 = vmul.f32 0.35355338, %v988_v59  ;;  %v3210_v61 = vpop.f32.mrb[7].mxu1 }
 0x52b   : > { %v1545_v61 = vld [vmem:[%s4119_s10 + $0x8] sm:$0xff] }
 0x52c   : > { %v993_v63 = vsel %vm751_vm3, %v992_v60, -inf }
 0x52d   : > { %994 = vmax.xlane.f32.xlu1 %v993_v63  ;;  %v1547_v63 = vld [vmem:[%s4119_s10 + $0x18] sm:$0xff] }
 0x531   : > { %1326 = vmax.xlane.f32.xlu1 %v1325_v0 }
 0x5ad   : > { %v1161_v1 = vpop.xlane.xlu0 %1160 }
 0x5ae   : > { %v1162_v2 = vsub.f32 %v1158_v52, %v1161_v1  ;;  %v1629_v1 = vld [vmem:[%s4121_s12] sm:$0xff] }
 0x5b0   : > { %v1163_v4 = vmul.f32 1.442695, %v1162_v2  ;;  %v1630_v2 = vld [vmem:[%s4121_s12 + $0x8] sm:$0xff] }
 0x5b2   : > { %3487 = vpow2.f32 %v1163_v4  ;;  %v1631_v4 = vld [vmem:[%s4121_s12 + $0x10] sm:$0xff] }
 0x5ba   : > { %v995_v5 = vpop.xlane.xlu1 %994 }
 0x5bb   : > { %v996_v14 = vsub.f32 %v992_v60, %v995_v5  ;;  %v1544_v60 = vld [vmem:[%s4119_s10] sm:$0xff]  ;;  %v3411_v5 = vpack.c.bf16 %v1630_v2, %v1629_v1 }
 0x5bc   : > { %v3488_v7 = vpop.eup %3487 }
 0x5bd   : > { %v1165_v8 = vsel %vm751_vm3, %v3488_v7, 0.0  ;;  %v997_v15 = vmul.f32 1.442695, %v996_v14 }
 0x5be   : > { %1166 = vadd.xlane.f32.xlu1 %v1165_v8  ;;  %v1327_v9 = vpop.xlane.xlu1 %1326 }
 0x5bf   : > { %v1328_v10 = vsub.f32 %v1324_v62, %v1327_v9  ;;  %v3405_v62 = vpack.c.bf16 %v1545_v61, %v1544_v60  ;;  %v1633_v9 = vld [vmem:[%s4121_s12 + $0x20] sm:$0xff] }
 0x5c1   : > { %v1329_v11 = vmul.f32 1.442695, %v1328_v10  ;;  %v1634_v10 = vld [vmem:[%s4121_s12 + $0x28] sm:$0xff] }
 0x5c3   : > { %3489 = vpow2.f32 %v1329_v11  ;;  %v3417_v11 = vpack.c.bf16 %v1634_v10, %v1633_v9 }
 0x5c4   : > { %3491 = vpow2.f32 %v997_v15 }
 0x5cd   : > { %v3490_v12 = vpop.eup %3489 }
 0x5ce   : > { %v1331_v13 = vsel %vm751_vm3, %v3490_v12, 0.0  ;;  %v3492_v16 = vpop.eup %3491 }
 0x5cf   : > { %1004 = vrot.lane.b32.xlu1 %v3729_v29, %s4133_s25  ;;  %1332 = vadd.xlane.f32.xlu0 %v1331_v13  ;;  %v999_v17 = vsel %vm751_vm3, %v3492_v16, 0.0 }
 0x5e5   : > { %1170 = vrot.lane.b32.xlu0 %v3729_v29, %s4131_s26 }
 0x5f3   : > { %1000 = vadd.xlane.f32.xlu1 %v999_v17 }
 0x604   : > { %1336 = vrot.lane.b32.xlu1 %v3729_v29, %s4130_s29  ;;  %s4147_s29 = smov 120  }
 0x64b   : > { %v1167_v18 = vpop.xlane.xlu1 %1166 }
 0x64f   : > { %v1005_v19 = vpop.permute.xlu1 %1004 }
 0x650   : > { %3212 = vmatpush3.msra.mxu1 %v1005_v19 }
 0x651   : > { %3221 = vmatprep.subr.mxu1 %v3537_v6 }
 0x65c   : > { %v1333_v21 = vpop.xlane.xlu0 %1332 }
 0x660   : > { %v1171_v26 = vpop.permute.xlu0 %1170 }
 0x680   : > { %v1001_v20 = vpop.xlane.xlu1 %1000 }
 0x681   : > { %3493 = vrcp.f32 %v1001_v20 }
 0x682   : > { %3495 = vrcp.f32 %v1167_v18  ;;  %v3008_v18 = vld [vmem:[%s4118_s9] ss:$0 sm:$0xff] }
 0x683   : > { %3497 = vrcp.f32 %v1333_v21  ;;  %v1635_v21 = vld [vmem:[%s4121_s12 + $0x30] sm:$0xff] }
 0x684   : > { %v1337_v29 = vpop.permute.xlu1 %1336 }
 0x68b   : > { %v3494_v22 = vpop.eup %3493 }
 0x68c   : > { %v1003_v23 = vmul.f32 %v3494_v22, %v3492_v16  ;;  %v3496_v24 = vpop.eup %3495  ;;  %v3007_v16 = vld [vmem:[%s4117_s8] ss:$0 sm:$0xff]  ;;  %v1636_v22 = vld [vmem:[%s4121_s12 + $0x38] sm:$0xff] }
 0x68d   : > { %v1169_v27 = vmul.f32 %v3496_v24, %v3488_v7  ;;  %v3498_v28 = vpop.eup %3497  ;;  %v1632_v7 = vld [vmem:[%s4121_s12 + $0x18] sm:$0xff]  ;;  %v3009_v24 = vld [vmem:[%s4120_s11] ss:$0 sm:$0xff] }
 0x68e   : > { %3214 = vmatmul.mubr.msk.f32.vlgmr.msra.gmra.mrb[8].mxu1 %vm751_vm3, %v1003_v23  ;;  %v1335_v30 = vmul.f32 %v3498_v28, %v3490_v12  ;;  %v3414_v8 = vpack.c.bf16 %v1632_v7, %v1631_v4  ;;  %v3420_v23 = vpack.c.bf16 %v1636_v22, %v1635_v21 }
 0x68f   : > { %3222 = vmatpush3.msra.mxu1 %v1171_v26  ;;  %3223 = vmatprep.mubr.msk.f32.mxu1 %vm3536_vm0, %v3537_v6 }
 0x690   : > { %3231 = vmatprep.subr.mxu1 %v3537_v6 }
 0x692   : > { %3224 = vmatmul.mubr.msk.f32.vlgmr.msra.gmra.mrb[10].mxu1 %vm751_vm3, %v1169_v27 }
 0x693   : > { %3232 = vmatpush3.msra.mxu1 %v1337_v29  ;;  %3233 = vmatprep.mubr.msk.f32.mxu1 %vm3536_vm0, %v3537_v6 }
 0x694   : > { %3404 = vmatprep.subr.bf16.mxu1 %v3535_v3 }
 0x696   : > { %3234 = vmatmul.mubr.msk.f32.vlgmr.msra.gmra.mrb[12].mxu1 %vm751_vm3, %v1335_v30  ;;  %v3011_v30 = vld [vmem:[%s4122_s13] ss:$0 sm:$0xff] }
 0x697   : > { %3255 = vmatprep.mubr.msk.f32.mxu1 %vm3536_vm0, %v3537_v6  ;;  %3406 = vmatpush3.bf16.msra.mxu1 %v3405_v62 }
 0x698   : > { %3407 = vmatprep.subr.bf16.mxu1 %v3535_v3 }
 0x761   : > { %v1076_v37 = vpop.f32.mrb[8].mxu1 }
 0x762   : > { %1413 = vrot.lane.b32.xlu1 %v1076_v37, %s4139_s23  ;;  %v3215_v38 = vpop.f32.mrb[9].mxu1 }
 0x765   : > { %v1242_v39 = vpop.f32.mrb[10].mxu1 }
 0x766   : > { %1417 = vrot.lane.b32.xlu0 %v1242_v39, %s4138_s30  ;;  %v3225_v40 = vpop.f32.mrb[11].mxu1 }
 0x769   : > { %v1408_v41 = vpop.f32.mrb[12].mxu1 }
 0x76a   : > { %1421 = vrot.lane.b32.xlu1 %v1408_v41, %s4137_s22  ;;  %v3235_v42 = vpop.f32.mrb[13].mxu1  ;;  %v3015_v41 = vld [vmem:[%s4113_s4 + $0x20] sm:$0xff]  ;;  %s4149_s22 = smov 80  }
 0x76b   : > { %v3016_v42 = vld [vmem:[%s4113_s4 + $0x28] sm:$0xff] }
 0x7d4   : > { %v1414_v43 = vpop.permute.xlu1 %1413 }
 0x7d5   : > { %v1424_v45 = vsel %vm751_vm3, %v3775_v57, %v1414_v43  ;;  %v3423_v43 = vpack.c.bf16 %v3016_v42, %v3015_v41 }
 0x7d8   : > { %v1418_v44 = vpop.permute.xlu0 %1417 }
 0x7d9   : > { %v1426_v46 = vsel %vm1425_vm4, %v1424_v45, %v1418_v44  ;;  %v3017_v44 = vld [vmem:[%s4113_s4 + $0x30] sm:$0xff]  ;;  %v3018_v45 = vld [vmem:[%s4113_s4 + $0x38] sm:$0xff] }
 0x7dc   : > { %v1422_v47 = vpop.permute.xlu1 %1421 }
 0x7dd   : > { %v1428_v48 = vsel %vm1427_vm5, %v1426_v46, %v1422_v47  ;;  %v3426_v46 = vpack.c.bf16 %v3018_v45, %v3017_v44 }
 0x7de   : > { %3245 = vmatmul.mubr.msk.f32.vlgmr.msra.gmra.mrb[6].mxu0 %vm674_vm2, %v1428_v48 }
 0x7df   : > { %3274 = vmatprep.mubr.msk.f32.mxu0 %vm3536_vm0, %v3537_v6  ;;  %3412 = vmatpush3.bf16.msra.mxu0 %v3411_v5 }
 0x7e0   : > { %3413 = vmatprep.subr.bf16.mxu0 %v3535_v3 }
 0x7e3   : > { %3415 = vmatpush3.bf16.msra.mxu0 %v3414_v8 }
 0x7e4   : > { %3416 = vmatprep.subr.bf16.mxu0 %v3535_v3 }
 0x7e7   : > { %3418 = vmatpush3.bf16.msra.mxu0 %v3417_v11 }
 0x7e8   : > { %3419 = vmatprep.subr.bf16.mxu0 %v3535_v3 }
 0x7eb   : > { %3421 = vmatpush3.bf16.msra.mxu0 %v3420_v23 }
 0x7ec   : > { %3298 = vmatprep.subr.mxu0 %v3537_v6 }
 0x8b1   : > { %v1509_v50 = vpop.f32.mrb[6].mxu0 }
 0x8b2   : > { %v1510_v51 = vadd.f32 %v3005_v49, %v1509_v50  ;;  %v3246_v52 = vpop.f32.mrb[7].mxu0 }
 0x8b4   : > { %v1513_v53 = vadd.f32 %v1510_v51, %v3720_v25  ;;  %v1546_v25 = vld [vmem:[%s4119_s10 + $0x10] sm:$0xff]  ;;  %v3013_v51 = vld [vmem:[%s4123_s14] ss:$0 sm:$0xff] }
 0x8b5   : > { %v3408_v0 = vpack.c.bf16 %v1547_v63, %v1546_v25 }
 0x8b6   : > { %v1514_v54 = vsel %vm674_vm2, %v1513_v53, 0.0 }
 0x8b7   : > { %1515 = vadd.xlane.f32.xlu0 %v1514_v54  ;;  %3409 = vmatpush3.bf16.msra.mxu1 %v3408_v0 }
 0x8b8   : > { %3422 = vmatprep.subr.bf16.mxu1 %v3535_v3 }
 0x944   : > { %v1516_v55 = vpop.xlane.xlu0 %1515 }
 0x945   : > { %v1518_v56 = vmul.f32 0.03125, %v1516_v55 }
 0x947   : > { %v1519_v57 = vsub.f32 %v1513_v53, %v1518_v56  ;;  %v3014_v53 = vld [vmem:[%s4124_s15] ss:$0 sm:$0xff]  ;;  %v3020_v56 = vld [vmem:[%s4114_s5 + $0x1] ss:$0 sm:$0xff] }
 0x949   : > { %v1520_v58 = vmul.f32 %v1519_v57, %v1519_v57 }
 0x94b   : > { %v1521_v59 = vsel %vm674_vm2, %v1520_v58, 0.0 }
 0x94c   : > { %1522 = vadd.xlane.f32.xlu1 %v1521_v59 }
 0x9d9   : > { %v1523_v12 = vpop.xlane.xlu1 %1522 }
 0x9da   : > { %v1524_v13 = vmul.f32 0.03125, %v1523_v12 }
 0x9dc   : > { %v1525_v14 = vadd.f32 1e-05, %v1524_v13 }
 0x9de   : > { %3499 = vrsqrt.f32 %v1525_v14 }
 0x9e8   : > { %v3500_v15 = vpop.eup %3499 }
 0x9e9   : > { %v1527_v17 = vmul.f32 %v3500_v15, %v1519_v57 }
 0x9eb   : > { %v1535_v19 = vmul.f32 %v3007_v16, %v1527_v17 }
 0x9ed   : > { %v1543_v20 = vadd.f32 %v3008_v18, %v1535_v19 }
 0x9ef   : > { %3256 = vmatmul.mubr.msk.f32.vlgmr.msra.gmra.mrb[14].mxu1 %vm674_vm2, %v1543_v20 }
 0x9f0   : > { %3285 = vmatprep.mubr.msk.f32.mxu1 %vm3536_vm0, %v3537_v6  ;;  %3424 = vmatpush3.bf16.msra.mxu1 %v3423_v43 }
 0x9f1   : > { %3425 = vmatprep.subr.bf16.mxu1 %v3535_v3 }
 0x9f4   : > { %3427 = vmatpush3.bf16.msra.mxu1 %v3426_v46 }
 0x9f5   : > { %3288 = vmatprep.subr.mxu1 %v3537_v6 }
 0xac2   : > { %v1624_v26 = vpop.f32.mrb[14].mxu1 }
 0xac3   : > { %v1625_v27 = vadd.f32 %v3009_v24, %v1624_v26  ;;  %v3257_v28 = vpop.f32.mrb[15].mxu1 }
 0xac5   : > { %v1628_v29 = vmax.f32 %v1625_v27, 0.0 }
 0xac7   : > { %3275 = vmatmul.mubr.msk.f32.vlgmr.msra.gmra.mrb[8].mxu0 %vm589_vm1, %v1628_v29 }
 0xac8   : > { %3300 = vmatprep.mubr.msk.f32.mxu0 %vm3536_vm0, %v3537_v6 }
 0xb9a   : > { %v1713_v31 = vpop.f32.mrb[8].mxu0 }
 0xb9b   : > { %v1714_v32 = vadd.f32 %v3011_v30, %v1713_v31  ;;  %v3276_v33 = vpop.f32.mrb[9].mxu0 }
 0xb9d   : > { %v1717_v34 = vadd.f32 %v1714_v32, %v1543_v20 }
 0xb9f   : > { %v1718_v35 = vsel %vm674_vm2, %v1717_v34, 0.0 }
 0xba0   : > { %1719 = vadd.xlane.f32.xlu0 %v1718_v35 }
 0xc2d   : > { %v1720_v36 = vpop.xlane.xlu0 %1719 }
 0xc2e   : > { %v1721_v37 = vmul.f32 0.03125, %v1720_v36 }
 0xc30   : > { %v1722_v38 = vsub.f32 %v1717_v34, %v1721_v37 }
 0xc32   : > { %v1723_v39 = vmul.f32 %v1722_v38, %v1722_v38 }
 0xc34   : > { %v1724_v40 = vsel %vm674_vm2, %v1723_v39, 0.0 }
 0xc35   : > { %1725 = vadd.xlane.f32.xlu0 %v1724_v40 }
 0xcc2   : > { %v1726_v47 = vpop.xlane.xlu0 %1725 }
 0xcc3   : > { %v1727_v48 = vmul.f32 0.03125, %v1726_v47 }
 0xcc5   : > { %v1728_v49 = vadd.f32 1e-05, %v1727_v48 }
 0xcc7   : > { %3501 = vrsqrt.f32 %v1728_v49 }
 0xcd1   : > { %v3502_v50 = vpop.eup %3501 }
 0xcd2   : > { %v1730_v52 = vmul.f32 %v3502_v50, %v1722_v38 }
 0xcd4   : > { %v1738_v54 = vmul.f32 %v3013_v51, %v1730_v52 }
 0xcd6   : > { %v3912_v55 = vadd.f32 %v3014_v53, %v1738_v54 }
 0xcd8   : > { %3286 = vmatmul.mubr.msk.f32.vlgmr.msra.gmra.mrb[16].mxu1 %vm674_vm2, %v3912_v55 }
 0xcd9   : > { %3290 = vmatprep.mubr.msk.f32.mxu1 %vm3536_vm0, %v3537_v6 }
 0xdab   : > { %v1829_v57 = vpop.f32.mrb[16].mxu1 }
 0xdac   : > { %v3921_v58 = vadd.f32 %v3020_v56, %v1829_v57  ;;  %v3287_v59 = vpop.f32.mrb[17].mxu1 }
 0xdad   : > { %v3035_v59 = vld [vmem:[%s4115_s6 + $0x28] sm:$0xff] }
 0xdae   : > { %2000 = vrot.lane.b32.xlu0 %v3921_v58, %s3540_s1  ;;  %1834 = vrot.lane.b32.xlu1 %v3921_v58, %s3539_s19  ;;  %s4151_s19 = smov 56   ;;  %s4152_s1 = smov 64  }
 0xdb2   : > { %2164 = vrot.lane.b32.xlu0 %v3921_v58, %s3544_s2  ;;  %1998 = vrot.lane.b32.xlu1 %v3921_v58, %s4147_s29  ;;  %s4153_s2 = smov 48   ;;  %s4155_s29 = smov 8  }
 0xdb6   : > { %2330 = vrot.lane.b32.xlu0 %v3921_v58, %s4148_s21  ;;  %2166 = vrot.lane.b32.xlu1 %v3921_v58, %s4149_s22 }
 0xdba   : > { %2332 = vrot.lane.b32.xlu1 %v3921_v58, %s4150_s20 }
 0xe20   : > { %v2001_v60 = vpop.permute.xlu0 %2000  ;;  %v1835_v61 = vpop.permute.xlu1 %1834 }
 0xe21   : > { %3289 = vmatpush3.xpose.msk.msra.mxu1 %vm751_vm3, %v1835_v61  ;;  %3299 = vmatpush3.xpose.msk.msra.mxu0 %vm751_vm3, %v2001_v60 }
 0xe22   : > { %3308 = vmatprep.subr.mxu0 %v3537_v6  ;;  %3293 = vmatprep.subr.mxu1 %v3537_v6 }
 0xe24   : > { %3291 = vmatmul.mubr.msk.f32.vlgmr.msra.gmra.mrb[18].mxu1 %vm751_vm3, %v3921_v58  ;;  %v1999_v62 = vpop.permute.xlu1 %1998  ;;  %v2165_v63 = vpop.permute.xlu0 %2164 }
 0xe25   : > { %3301 = vmatmul.mubr.msk.f32.vlgmr.msra.gmra.mrb[10].mxu0 %vm751_vm3, %v1999_v62  ;;  %3295 = vmatprep.mubr.msk.f32.mxu1 %vm3536_vm0, %v3537_v6 }
 0xe26   : > { %3310 = vmatprep.mubr.msk.f32.mxu0 %vm3536_vm0, %v3537_v6 }
 0xe28   : > { %v2167_v25 = vpop.permute.xlu1 %2166  ;;  %v2331_v1 = vpop.permute.xlu0 %2330 }
 0xe29   : > { %3309 = vmatpush3.xpose.msk.msra.mxu0 %vm751_vm3, %v2167_v25 }
 0xe2a   : > { %3318 = vmatprep.subr.mxu0 %v3537_v6 }
 0xe2c   : > { %3311 = vmatmul.mubr.msk.f32.vlgmr.msra.gmra.mrb[12].mxu0 %vm751_vm3, %v2165_v63  ;;  %v2333_v0 = vpop.permute.xlu1 %2332 }
 0xe2d   : > { %3319 = vmatpush3.xpose.msk.msra.mxu0 %vm751_vm3, %v2333_v0  ;;  %3320 = vmatprep.mubr.msk.f32.mxu0 %vm3536_vm0, %v3537_v6  ;;  %v3036_v0 = vld [vmem:[%s4115_s6 + $0x30] sm:$0xff] }
 0xe2e   : > { %3428 = vmatprep.subr.bf16.mxu0 %v3535_v3 }
 0xe30   : > { %3321 = vmatmul.mubr.msk.f32.vlgmr.msra.gmra.mrb[14].mxu0 %vm751_vm3, %v2331_v1  ;;  %v3037_v1 = vld [vmem:[%s4115_s6 + $0x38] sm:$0xff] }
 0xe31   : > { %3336 = vmatprep.mubr.msk.f32.mxu0 %vm3536_vm0, %v3537_v6 }
 0xef7   : > { %v1906_v2 = vpop.f32.mrb[18].mxu1 }
 0xef8   : > { %v1910_v4 = vmul.f32 0.35355338, %v1906_v2  ;;  %v3292_v5 = vpop.f32.mrb[19].mxu1  ;;  %v2072_v7 = vpop.f32.mrb[10].mxu0  ;;  %v3432_v2 = vpack.c.bf16 %v3037_v1, %v3036_v0 }
 0xef9   : > { %v2076_v8 = vmul.f32 0.35355338, %v2072_v7  ;;  %v3302_v9 = vpop.f32.mrb[11].mxu0 }
 0xefa   : > { %v1911_v10 = vsel %vm751_vm3, %v1910_v4, -inf }
 0xefb   : > { %1912 = vmax.xlane.f32.xlu1 %v1911_v10  ;;  %v2077_v11 = vsel %vm751_vm3, %v2076_v8, -inf }
 0xefc   : > { %2078 = vmax.xlane.f32.xlu0 %v2077_v11 }
 0xeff   : > { %v2238_v12 = vpop.f32.mrb[12].mxu0 }
 0xf00   : > { %v2242_v13 = vmul.f32 0.35355338, %v2238_v12  ;;  %v3312_v14 = vpop.f32.mrb[13].mxu0 }
 0xf02   : > { %v2243_v15 = vsel %vm751_vm3, %v2242_v13, -inf }
 0xf03   : > { %2244 = vmax.xlane.f32.xlu0 %v2243_v15  ;;  %v2404_v16 = vpop.f32.mrb[14].mxu0  ;;  %v3039_v15 = vld [vmem:[%s4116_s7 + $0x1] ss:$0 sm:$0xff] }
 0xf04   : > { %v2408_v17 = vmul.f32 0.35355338, %v2404_v16  ;;  %v3322_v18 = vpop.f32.mrb[15].mxu0 }
 0xf06   : > { %v2409_v19 = vsel %vm751_vm3, %v2408_v17, -inf }
 0xf07   : > { %2410 = vmax.xlane.f32.xlu1 %v2409_v19 }
 0xf18   : > { %2088 = vrot.lane.b32.xlu1 %v3921_v58, %s4151_s19 }
 0xf88   : > { %v1913_v20 = vpop.xlane.xlu1 %1912 }
 0xf89   : > { %v1914_v21 = vsub.f32 %v1910_v4, %v1913_v20  ;;  %v2079_v22 = vpop.xlane.xlu0 %2078 }
 0xf8a   : > { %v2080_v23 = vsub.f32 %v2076_v8, %v2079_v22 }
 0xf8b   : > { %v1915_v24 = vmul.f32 1.442695, %v1914_v21 }
 0xf8c   : > { %v2081_v26 = vmul.f32 1.442695, %v2080_v23 }
 0xf8d   : > { %3503 = vpow2.f32 %v1915_v24 }
 0xf8e   : > { %3505 = vpow2.f32 %v2081_v26 }
 0xf90   : > { %v2245_v36 = vpop.xlane.xlu0 %2244 }
 0xf91   : > { %v2246_v37 = vsub.f32 %v2242_v13, %v2245_v36  ;;  %v3055_v36 = vld [vmem:[%s4121_s12 + $0x58] sm:$0xff] }
 0xf93   : > { %v2247_v38 = vmul.f32 1.442695, %v2246_v37 }
 0xf94   : > { %v2411_v27 = vpop.xlane.xlu1 %2410 }
 0xf95   : > { %v2412_v28 = vsub.f32 %v2408_v17, %v2411_v27  ;;  %v3045_v27 = vld [vmem:[%s4119_s10 + $0x20] sm:$0xff] }
 0xf97   : > { %v3504_v29 = vpop.eup %3503  ;;  %v2413_v30 = vmul.f32 1.442695, %v2412_v28  ;;  %v3046_v28 = vld [vmem:[%s4119_s10 + $0x28] sm:$0xff] }
 0xf98   : > { %v3506_v31 = vpop.eup %3505  ;;  %v1917_v32 = vsel %vm751_vm3, %v3504_v29, 0.0  ;;  %v2089_v41 = vpop.permute.xlu1 %2088 }
 0xf99   : > { %3507 = vpow2.f32 %v2413_v30  ;;  %1918 = vadd.xlane.f32.xlu0 %v1917_v32  ;;  %v2083_v33 = vsel %vm751_vm3, %v3506_v31, 0.0  ;;  %v3048_v30 = vld [vmem:[%s4119_s10 + $0x38] sm:$0xff]  ;;  %v3052_v32 = vld [vmem:[%s4121_s12 + $0x40] sm:$0xff] }
 0xf9a   : > { %2084 = vadd.xlane.f32.xlu1 %v2083_v33  ;;  %3509 = vpow2.f32 %v2247_v38  ;;  %v3053_v33 = vld [vmem:[%s4121_s12 + $0x48] sm:$0xff]  ;;  %v3056_v38 = vld [vmem:[%s4121_s12 + $0x60] sm:$0xff] }
 0xfa3   : > { %v3508_v34 = vpop.eup %3507 }
 0xfa4   : > { %v2415_v35 = vsel %vm751_vm3, %v3508_v34, 0.0  ;;  %v3510_v39 = vpop.eup %3509 }
 0xfa5   : > { %2416 = vadd.xlane.f32.xlu1 %v2415_v35  ;;  %v2249_v40 = vsel %vm751_vm3, %v3510_v39, 0.0  ;;  %v3441_v35 = vpack.c.bf16 %v3053_v33, %v3052_v32 }
 0xfaf   : > { %1922 = vrot.lane.b32.xlu0 %v3921_v58, %s4152_s1  ;;  %s4156_s1 = smov 16  }
 0xfb6   : > { %2254 = vrot.lane.b32.xlu1 %v3921_v58, %s4153_s2  ;;  %s4157_s2 = smov 24  }
 0xfce   : > { %2250 = vadd.xlane.f32.xlu0 %v2249_v40 }
 0xfe4   : > { %2420 = vrot.lane.b32.xlu0 %v3921_v58, %s4154_s24  ;;  %v3034_v58 = vld [vmem:[%s4115_s6 + $0x20] sm:$0xff]  ;;  %s4158_s24 = sshll.u32 %s4160_s28, 3 }
 0xfe5   : > { %v3429_v60 = vpack.c.bf16 %v3035_v59, %v3034_v58  ;;  %s570_s25 = scalar_lea.vmem %s4127_s18, %s4158_s24 }
 0xfe7   : > { %3430 = vmatpush3.bf16.msra.mxu0 %v3429_v60 }
 0xfe8   : > { %3431 = vmatprep.subr.bf16.mxu0 %v3535_v3 }
 0xfeb   : > { %3433 = vmatpush3.bf16.msra.mxu0 %v3432_v2 }
 0xfec   : > { %3440 = vmatprep.subr.bf16.mxu0 %v3535_v3 }
0x1026   : > { %v1919_v42 = vpop.xlane.xlu0 %1918 }
0x1027   : > { %3511 = vrcp.f32 %v1919_v42  ;;  %v2085_v43 = vpop.xlane.xlu1 %2084 }
0x1028   : > { %3513 = vrcp.f32 %v2085_v43 }
0x102a   : > { %v1923_v44 = vpop.permute.xlu0 %1922 }
0x102b   : > { %3294 = vmatpush3.msra.mxu1 %v1923_v44 }
0x102c   : > { %3303 = vmatprep.subr.mxu1 %v3537_v6 }
0x1031   : > { %v3512_v45 = vpop.eup %3511 }
0x1032   : > { %v1921_v46 = vmul.f32 %v3512_v45, %v3504_v29  ;;  %v2417_v47 = vpop.xlane.xlu1 %2416  ;;  %v3514_v48 = vpop.eup %3513  ;;  %v3435_v29 = vpack.c.bf16 %v3046_v28, %v3045_v27  ;;  %v3042_v45 = vld [vmem:[%s4117_s8 + $0x1] ss:$0 sm:$0xff] }
0x1033   : > { %v2087_v49 = vmul.f32 %v3514_v48, %v3506_v31 }
0x1034   : > { %3296 = vmatmul.mubr.msk.f32.vlgmr.msra.gmra.mrb[20].mxu1 %vm751_vm3, %v1921_v46 }
0x1035   : > { %3304 = vmatpush3.msra.mxu1 %v2089_v41  ;;  %3305 = vmatprep.mubr.msk.f32.mxu1 %vm3536_vm0, %v3537_v6 }
0x1036   : > { %v2255_v50 = vpop.permute.xlu1 %2254  ;;  %3313 = vmatprep.subr.mxu1 %v3537_v6 }
0x1038   : > { %3306 = vmatmul.mubr.msk.f32.vlgmr.msra.gmra.mrb[22].mxu1 %vm751_vm3, %v2087_v49 }
0x1039   : > { %3314 = vmatpush3.msra.mxu1 %v2255_v50  ;;  %3315 = vmatprep.mubr.msk.f32.mxu1 %vm3536_vm0, %v3537_v6  ;;  %v3058_v50 = vld [vmem:[%s4121_s12 + $0x70] sm:$0xff] }
0x103a   : > { %3323 = vmatprep.subr.mxu1 %v3537_v6 }
0x105b   : > { %v2251_v51 = vpop.xlane.xlu0 %2250 }
0x105c   : > { %3515 = vrcp.f32 %v2251_v51  ;;  %v3059_v51 = vld [vmem:[%s4121_s12 + $0x78] sm:$0xff] }
0x105d   : > { %3517 = vrcp.f32 %v2417_v47  ;;  %v3044_v47 = vld [vmem:[%s4118_s9 + $0x1] ss:$0 sm:$0xff] }
0x105f   : > { %v2421_v56 = vpop.permute.xlu0 %2420 }
0x1066   : > { %v3516_v52 = vpop.eup %3515 }
0x1067   : > { %v2253_v53 = vmul.f32 %v3516_v52, %v3510_v39  ;;  %v3518_v54 = vpop.eup %3517  ;;  %v3057_v39 = vld [vmem:[%s4121_s12 + $0x68] sm:$0xff]  ;;  %v3450_v52 = vpack.c.bf16 %v3059_v51, %v3058_v50 }
0x1068   : > { %v2419_v57 = vmul.f32 %v3518_v54, %v3508_v34  ;;  %v3054_v34 = vld [vmem:[%s4121_s12 + $0x50] sm:$0xff]  ;;  %v3447_v40 = vpack.c.bf16 %v3057_v39, %v3056_v38 }
0x1069   : > { %3316 = vmatmul.mubr.msk.f32.vlgmr.msra.gmra.mrb[24].mxu1 %vm751_vm3, %v2253_v53  ;;  %v3444_v37 = vpack.c.bf16 %v3055_v36, %v3054_v34  ;;  %v3050_v53 = vld [vmem:[%s4120_s11 + $0x1] ss:$0 sm:$0xff] }
0x106a   : > { %3324 = vmatpush3.msra.mxu1 %v2421_v56  ;;  %3325 = vmatprep.mubr.msk.f32.mxu1 %vm3536_vm0, %v3537_v6 }
0x106b   : > { %3434 = vmatprep.subr.bf16.mxu1 %v3535_v3 }
0x106d   : > { %3326 = vmatmul.mubr.msk.f32.vlgmr.msra.gmra.mrb[26].mxu1 %vm751_vm3, %v2419_v57 }
0x106e   : > { %3347 = vmatprep.mubr.msk.f32.mxu1 %vm3536_vm0, %v3537_v6  ;;  %3436 = vmatpush3.bf16.msra.mxu1 %v3435_v29 }
0x106f   : > { %3437 = vmatprep.subr.bf16.mxu1 %v3535_v3 }
0x1107   : > { %v1994_v61 = vpop.f32.mrb[20].mxu1 }
0x1108   : > { %v3297_v62 = vpop.f32.mrb[21].mxu1 }
0x110b   : > { %v2160_v25 = vpop.f32.mrb[22].mxu1 }
0x110c   : > { %2497 = vrot.lane.b32.xlu1 %v2160_v25, %s4155_s29  ;;  %v3307_v63 = vpop.f32.mrb[23].mxu1 }
0x113c   : > { %v2326_v4 = vpop.f32.mrb[24].mxu1 }
0x113d   : > { %2501 = vrot.lane.b32.xlu0 %v2326_v4, %s4156_s1  ;;  %v3317_v5 = vpop.f32.mrb[25].mxu1 }
0x113e   : > { %v2838_v5 = vld [vmem:[%s4125_s16] sm:$0xff] }
0x1140   : > { %v2492_v7 = vpop.f32.mrb[26].mxu1 }
0x1141   : > { %2505 = vrot.lane.b32.xlu1 %v2492_v7, %s4157_s2  ;;  %v3327_v8 = vpop.f32.mrb[27].mxu1  ;;  %v2839_v7 = vld [vmem:[%s4125_s16 + $0x8] sm:$0xff] }
0x1142   : > { %v3453_v8 = vpack.c.bf16 %v2839_v7, %v2838_v5 }
0x117e   : > { %v2498_v9 = vpop.permute.xlu1 %2497 }
0x117f   : > { %v2508_v11 = vsel %vm751_vm3, %v1994_v61, %v2498_v9  ;;  %v2840_v9 = vld [vmem:[%s4125_s16 + $0x10] sm:$0xff] }
0x11af   : > { %v2502_v10 = vpop.permute.xlu0 %2501 }
0x11b0   : > { %v2509_v12 = vsel %vm1425_vm4, %v2508_v11, %v2502_v10  ;;  %v2841_v10 = vld [vmem:[%s4125_s16 + $0x18] sm:$0xff] }
0x11b1   : > { %v3456_v11 = vpack.c.bf16 %v2841_v10, %v2840_v9 }
0x11b3   : > { %v2506_v13 = vpop.permute.xlu1 %2505 }
0x11b4   : > { %v2510_v14 = vsel %vm1427_vm5, %v2509_v12, %v2506_v13 }
0x11b5   : > { %3337 = vmatmul.mubr.msk.f32.vlgmr.msra.gmra.mrb[16].mxu0 %vm674_vm2, %v2510_v14 }
0x11b6   : > { %3366 = vmatprep.mubr.msk.f32.mxu0 %vm3536_vm0, %v3537_v6  ;;  %3442 = vmatpush3.bf16.msra.mxu0 %v3441_v35 }
0x11b7   : > { %3443 = vmatprep.subr.bf16.mxu0 %v3535_v3 }
0x11ba   : > { %3445 = vmatpush3.bf16.msra.mxu0 %v3444_v37 }
0x11bb   : > { %3446 = vmatprep.subr.bf16.mxu0 %v3535_v3 }
0x11be   : > { %3448 = vmatpush3.bf16.msra.mxu0 %v3447_v40 }
0x11bf   : > { %3449 = vmatprep.subr.bf16.mxu0 %v3535_v3 }
0x11c2   : > { %3451 = vmatpush3.bf16.msra.mxu0 %v3450_v52 }
0x1288   : > { %v2593_v16 = vpop.f32.mrb[16].mxu0 }
0x1289   : > { %v2594_v17 = vadd.f32 %v3039_v15, %v2593_v16  ;;  %v3338_v18 = vpop.f32.mrb[17].mxu0 }
0x128b   : > { %v2597_v19 = vadd.f32 %v2594_v17, %v3912_v55  ;;  %v3047_v55 = vld [vmem:[%s4119_s10 + $0x30] sm:$0xff]  ;;  %v3066_v17 = vld [vmem:[%s4124_s15 + $0x1] ss:$0 sm:$0xff] }
0x128c   : > { %v3438_v31 = vpack.c.bf16 %v3048_v30, %v3047_v55 }
0x128d   : > { %v2598_v20 = vsel %vm674_vm2, %v2597_v19, 0.0 }
0x128e   : > { %2599 = vadd.xlane.f32.xlu0 %v2598_v20  ;;  %3439 = vmatpush3.bf16.msra.mxu1 %v3438_v31  ;;  %v3067_v20 = vld [vmem:[%s4126_s17] ss:$0 sm:$0xff] }
0x128f   : > { %3452 = vmatprep.subr.bf16.mxu1 %v3535_v3 }
0x131b   : > { %v2600_v21 = vpop.xlane.xlu0 %2599 }
0x131c   : > { %v2601_v22 = vmul.f32 0.03125, %v2600_v21 }
0x131e   : > { %v2602_v23 = vsub.f32 %v2597_v19, %v2601_v22 }
0x1320   : > { %v2603_v24 = vmul.f32 %v2602_v23, %v2602_v23 }
0x1322   : > { %v2604_v26 = vsel %vm674_vm2, %v2603_v24, 0.0 }
0x1323   : > { %2605 = vadd.xlane.f32.xlu1 %v2604_v26 }
0x13b0   : > { %v2606_v41 = vpop.xlane.xlu1 %2605 }
0x13b1   : > { %v2607_v42 = vmul.f32 0.03125, %v2606_v41 }
0x13b3   : > { %v2608_v43 = vadd.f32 1e-05, %v2607_v42 }
0x13b5   : > { %3519 = vrsqrt.f32 %v2608_v43 }
0x13bf   : > { %v3520_v44 = vpop.eup %3519 }
0x13c0   : > { %v2610_v46 = vmul.f32 %v3520_v44, %v2602_v23 }
0x13c2   : > { %v2619_v48 = vmul.f32 %v3042_v45, %v2610_v46 }
0x13c4   : > { %v2628_v49 = vadd.f32 %v3044_v47, %v2619_v48 }
0x13c6   : > { %3348 = vmatmul.mubr.msk.f32.vlgmr.msra.gmra.mrb[28].mxu1 %vm674_vm2, %v2628_v49 }
0x13c7   : > { %3377 = vmatprep.mubr.msk.f32.mxu1 %vm3536_vm0, %v3537_v6  ;;  %v3061_v6 = vld [vmem:[%s4122_s13 + $0x1] ss:$0 sm:$0xff]  ;;  %3454 = vmatpush3.bf16.msra.mxu1 %v3453_v8 }
0x13c8   : > { %3455 = vmatprep.subr.bf16.mxu1 %v3535_v3  ;;  %v3064_v3 = vld [vmem:[%s4123_s14 + $0x1] ss:$0 sm:$0xff] }
0x13cb   : > { %3457 = vmatpush3.bf16.msra.mxu1 %v3456_v11 }
0x1499   : > { %v2711_v54 = vpop.f32.mrb[28].mxu1 }
0x149a   : > { %v2712_v56 = vadd.f32 %v3050_v53, %v2711_v54  ;;  %v3349_v57 = vpop.f32.mrb[29].mxu1 }
0x149c   : > { %v2715_v58 = vmax.f32 %v2712_v56, 0.0 }
0x149e   : > { %3367 = vmatmul.mubr.msk.f32.vlgmr.msra.gmra.mrb[18].mxu0 %vm589_vm1, %v2715_v58 }
0x1571   : > { %v2802_v59 = vpop.f32.mrb[18].mxu0 }
0x1572   : > { %v2803_v60 = vadd.f32 %v3061_v6, %v2802_v59  ;;  %v3368_v61 = vpop.f32.mrb[19].mxu0 }
0x1574   : > { %v2806_v62 = vadd.f32 %v2803_v60, %v2628_v49 }
0x1576   : > { %v2807_v25 = vsel %vm674_vm2, %v2806_v62, 0.0 }
0x1577   : > { %2808 = vadd.xlane.f32.xlu0 %v2807_v25 }
0x1604   : > { %v2809_v63 = vpop.xlane.xlu0 %2808 }
0x1605   : > { %v2810_v0 = vmul.f32 0.03125, %v2809_v63 }
0x1607   : > { %v2811_v1 = vsub.f32 %v2806_v62, %v2810_v0 }
0x1609   : > { %v2812_v2 = vmul.f32 %v2811_v1, %v2811_v1 }
0x160b   : > { %v2813_v4 = vsel %vm674_vm2, %v2812_v2, 0.0 }
0x160c   : > { %2814 = vadd.xlane.f32.xlu0 %v2813_v4 }
0x1699   : > { %v2815_v12 = vpop.xlane.xlu0 %2814 }
0x169a   : > { %v2816_v13 = vmul.f32 0.03125, %v2815_v12 }
0x169c   : > { %v2817_v14 = vadd.f32 1e-05, %v2816_v13 }
0x169e   : > { %3521 = vrsqrt.f32 %v2817_v14 }
0x16a8   : > { %v3522_v15 = vpop.eup %3521 }
0x16a9   : > { %v2819_v16 = vmul.f32 %v3522_v15, %v2811_v1 }
0x16ab   : > { %v2828_v18 = vmul.f32 %v3064_v3, %v2819_v16 }
0x16ad   : > { %v2837_v19 = vadd.f32 %v3066_v17, %v2828_v18 }
0x16af   : > { %3378 = vmatmul.mubr.msk.f32.vlgmr.msra.gmra.mrb[30].mxu1 %vm674_vm2, %v2837_v19 }
0x1782   : > { %v2918_v21 = vpop.f32.mrb[30].mxu1 }
0x1783   : > { %v2919_v22 = vadd.f32 %v3067_v20, %v2918_v21  ;;  %v3379_v23 = vpop.f32.mrb[31].mxu1 }
0x1785   : > { %v3069_v24 = vmul.f32 -1.442695, %v2919_v22 }
0x1787   : > { %3523 = vpow2.f32 %v3069_v24 }
0x1791   : > { %v3524_v26 = vpop.eup %3523 }
0x1792   : > { %v2925_v27 = vadd.f32 1.0, %v3524_v26 }
0x1794   : > { %3525 = vrcp.f32 %v2925_v27 }
0x179e   : > { %v3526_v28 = vpop.eup %3525 }
0x179f   : > { %2928 = vst [vmem:[%s570_s25] sm:$0xff] %v3526_v28 }
0x17a0 PF: > { %s28_s27 = sadd.s32 1, %s3533_s27  }
0x17a1   : > { %p25_p4 = scmp.ge.s32.totalorder %s28_s27, 4  }
0x17a3   :  { %27 = sbr.rel (!%p25_p4) target bundleno = 4 (0x4), region = 134 }

</bundles_post_ra>
